<compile_context>
chip_gen: v7x
topology: tpu7x:2x2x1
jax: 0.10.0
libtpu: 0.0.40
codegen_flags: <defaults>
</compile_context>

<pallas_src>
import functools

import jax
import jax.numpy as jnp
from jax import lax
from jax.experimental import pallas as pl
from jax.experimental.pallas import tpu as pltpu


def _sil_critic_kernel(x_ref,
                       w1_ref, b1_ref,
                       w2_ref, b2_ref,
                       w3_ref, b3_ref,
                       w4_ref, b4_ref,
                       out_ref):
    """relu(W1 x) -> relu(W2 h) -> relu(W3 h) -> w4 . h, batch on the lane axis."""
    wdt = w1_ref.dtype                         # matmul-operand dtype (f32 or bf16)

    x = x_ref[...].astype(wdt)                 # (block_b, d_in) — native layout

    # Layer 1: contract d_in of both operands -> (hidden, block_b); the RHS
    # layout fix is ~a few vregs of XLU work, hidden under the MXU.
    h = lax.dot_general(w1_ref[...], x,
                        dimension_numbers=(((1,), (1,)), ((), ())),
                        preferred_element_type=jnp.float32)
    h = jnp.maximum(h + b1_ref[...], 0.0)      # bias/ReLU stay f32 on the VPU

    h = jnp.dot(w2_ref[...], h.astype(wdt), preferred_element_type=jnp.float32)
    h = jnp.maximum(h + b2_ref[...], 0.0)

    h = jnp.dot(w3_ref[...], h.astype(wdt), preferred_element_type=jnp.float32)
    h = jnp.maximum(h + b3_ref[...], 0.0)      # (hidden, block_b) f32

    # v_out (out_dim == 1): VPU multiply + XLU sublane reduction instead of an
    # MXU matmul that would pad 255 useless output columns.  Result is already
    # the lane-dense (1, block_b) output row.
    w4 = w4_ref[...].astype(jnp.float32)       # (hidden, 1), lane-broadcast
    v = jnp.sum(h * w4, axis=0, keepdims=True) + b4_ref[...]
    out_ref[...] = v.astype(out_ref.dtype)


@functools.partial(jax.jit, static_argnames=("block_b",))
def sil_critic_forward(x, params, *, block_b=None):
    """x: [B, obs+goal] -> value [B, 1] f32.

    params are in torch layout: W_i of shape [out, in], b_i of shape [out].
    Weights may be f32 or bf16 (bf16 halves weight HBM traffic and runs the
    MXU at its fast rate; activations are downcast to bf16 in-kernel in that
    case).  Explicit block_b, if given, should be a multiple of 256.
    """
    w1, b1, w2, b2, w3, b3, w4, b4 = params
    B, d_in = x.shape
    hidden = w1.shape[0]

    # Batch-tile selection (shapes are static under jit, so this is trace-time
    # Python).  Small batches: one full-array tile.  Large batches: aim for
    # >= 2 tiles (v7x megacore) with block_b in [256, 1024].
    if block_b is None:
        if B <= 256:
            block_b = B
        else:
            half = -(-B // 2)
            block_b = max(256, min(1024, -(-half // 256) * 256))
    block_b = min(block_b, B)                  # == B falls back to full-array blocks
    n_tiles = -(-B // block_b)                 # cdiv; partial last tile is masked

    # Biases as f32 columns (lane-broadcast in the kernel); w4 as a column.
    b1c = b1.astype(jnp.float32).reshape(hidden, 1)
    b2c = b2.astype(jnp.float32).reshape(hidden, 1)
    b3c = b3.astype(jnp.float32).reshape(hidden, 1)
    b4c = b4.astype(jnp.float32).reshape(1, 1)
    w4c = w4.reshape(hidden, 1)                # (1, hidden) -> (hidden, 1)

    def const(shape):
        return pl.BlockSpec(shape, lambda i: tuple(0 for _ in shape))

    out_t = pl.pallas_call(
        _sil_critic_kernel,
        out_shape=jax.ShapeDtypeStruct((1, B), jnp.float32),
        grid_spec=pltpu.PrefetchScalarGridSpec(
            num_scalar_prefetch=0,
            grid=(n_tiles,),
            in_specs=[
                pl.BlockSpec((block_b, d_in), lambda i: (i, 0)),   # x tile (native)
                const((hidden, d_in)), const((hidden, 1)),         # fc1
                const((hidden, hidden)), const((hidden, 1)),       # fc2
                const((hidden, hidden)), const((hidden, 1)),       # fc3
                const((hidden, 1)), const((1, 1)),                 # v_out
            ],
            out_specs=pl.BlockSpec((1, block_b), lambda i: (0, i)),
        ),
        compiler_params=pltpu.CompilerParams(
            dimension_semantics=("parallel",)),   # batch tiles shard across TCs
    )(x, w1, b1c, w2, b2c, w3, b3c, w4c, b4c)

    # (1, B) row -> (B, 1) column; tiny reshape, no HBM rewrite of x anywhere.
    return out_t.reshape(B, 1)


def init_params(key, d_in, hidden=256, out_dim=1):
    """torch.nn.Linear default init U(-1/sqrt(fan_in), 1/sqrt(fan_in)); W: [out, in]."""
    def linear(key, fan_in, fan_out):
        kw, kb = jax.random.split(key)
        bound = 1.0 / jnp.sqrt(fan_in)
        w = jax.random.uniform(kw, (fan_out, fan_in), jnp.float32, -bound, bound)
        b = jax.random.uniform(kb, (fan_out,), jnp.float32, -bound, bound)
        return w, b

    k1, k2, k3, k4 = jax.random.split(key, 4)
    w1, b1 = linear(k1, d_in, hidden)
    w2, b2 = linear(k2, hidden, hidden)
    w3, b3 = linear(k3, hidden, hidden)
    w4, b4 = linear(k4, hidden, out_dim)
    return (w1, b1, w2, b2, w3, b3, w4, b4)


def reference_forward(x, params):
    w1, b1, w2, b2, w3, b3, w4, b4 = params
    f32 = lambda p: p.astype(jnp.float32)
    h = jnp.maximum(x @ f32(w1).T + f32(b1), 0.0)
    h = jnp.maximum(h @ f32(w2).T + f32(b2), 0.0)
    h = jnp.maximum(h @ f32(w3).T + f32(b3), 0.0)
    return h @ f32(w4).T + f32(b4)


if __name__ == "__main__":
    # env_params = {'obs': 24, 'goal': 8}  -> input dim 32
    OBS, GOAL = 24, 8
    D_IN = OBS + GOAL
    BATCH = 8

    key = jax.random.PRNGKey(0)
    k_x, k_p = jax.random.split(key)
    x = jax.random.normal(k_x, (BATCH, D_IN), jnp.float32)
    params = init_params(k_p, D_IN)

    # f32 path, tiny batch (single full-array tile).
    value = jax.block_until_ready(sil_critic_forward(x, params))
    ref = reference_forward(x, params)
    assert value.shape == (BATCH, 1)
    assert jnp.allclose(value, ref, atol=1e-3, rtol=1e-3), "mismatch vs reference (f32)"

    # f32 path, batch not divisible by the tile (2 grid steps, masked last tile).
    x2 = jax.random.normal(k_x, (300, D_IN), jnp.float32)
    v2 = jax.block_until_ready(sil_critic_forward(x2, params))
    ref2 = reference_forward(x2, params)
    assert v2.shape == (300, 1)
    assert jnp.allclose(v2, ref2, atol=1e-3, rtol=1e-3), "mismatch vs reference (f32, ragged)"

    # bf16-weight path (fast MXU rate, half weight HBM traffic); f32 accumulate.
    bf16_params = tuple(p.astype(jnp.bfloat16) if p.ndim == 2 else p for p in params)
    v3 = jax.block_until_ready(sil_critic_forward(x, bf16_params))
    assert v3.shape == (BATCH, 1)
    assert bool(jnp.all(jnp.isfinite(v3)))
    assert jnp.allclose(v3, ref, atol=1e-1, rtol=1e-1), "bf16 path diverged from f32 reference"

    print("KERNEL_OK")
</pallas_src>

<mosaic_0001>
module attributes {stable_mosaic.version = 11 : i64} {
  func.func @_sil_critic_kernel(%arg0: i32, %arg1: memref<8x32xf32, #tpu.memory_space<vmem>>, %arg2: memref<256x32xf32, #tpu.memory_space<vmem>>, %arg3: memref<256x1xf32, #tpu.memory_space<vmem>>, %arg4: memref<256x256xf32, #tpu.memory_space<vmem>>, %arg5: memref<256x1xf32, #tpu.memory_space<vmem>>, %arg6: memref<256x256xf32, #tpu.memory_space<vmem>>, %arg7: memref<256x1xf32, #tpu.memory_space<vmem>>, %arg8: memref<256x1xf32, #tpu.memory_space<vmem>>, %arg9: memref<1x1xf32, #tpu.memory_space<vmem>>, %arg10: memref<1x8xf32, #tpu.memory_space<vmem>>) attributes {dimension_semantics = [#tpu.dimension_semantics<parallel>], iteration_bounds = array<i64: 1>, scalar_prefetch = 0 : i64, scratch_operands = 0 : i64, tpu.core_type = #tpu.core_type<tc>, window_params = [{transform_indices = @transform_0, window_bounds = array<i64: 8, 32>}, {pipeline_mode = #tpu.pipeline_mode<synchronous>, transform_indices = @transform_1, window_bounds = array<i64: 256, 32>}, {pipeline_mode = #tpu.pipeline_mode<synchronous>, transform_indices = @transform_2, window_bounds = array<i64: 256, 1>}, {pipeline_mode = #tpu.pipeline_mode<synchronous>, transform_indices = @transform_3, window_bounds = array<i64: 256, 256>}, {pipeline_mode = #tpu.pipeline_mode<synchronous>, transform_indices = @transform_4, window_bounds = array<i64: 256, 1>}, {pipeline_mode = #tpu.pipeline_mode<synchronous>, transform_indices = @transform_5, window_bounds = array<i64: 256, 256>}, {pipeline_mode = #tpu.pipeline_mode<synchronous>, transform_indices = @transform_6, window_bounds = array<i64: 256, 1>}, {pipeline_mode = #tpu.pipeline_mode<synchronous>, transform_indices = @transform_7, window_bounds = array<i64: 256, 1>}, {pipeline_mode = #tpu.pipeline_mode<synchronous>, transform_indices = @transform_8, window_bounds = array<i64: 1, 1>}, {transform_indices = @transform_9, window_bounds = array<i64: 1, 8>}]} {
    %c0 = arith.constant 0 : index
    %c0_0 = arith.constant 0 : index
    %0 = vector.load %arg1[%c0, %c0_0] : memref<8x32xf32, #tpu.memory_space<vmem>>, vector<8x32xf32>
    %c0_1 = arith.constant 0 : index
    %c0_2 = arith.constant 0 : index
    %1 = vector.load %arg2[%c0_1, %c0_2] : memref<256x32xf32, #tpu.memory_space<vmem>>, vector<256x32xf32>
    %cst = arith.constant dense<0.000000e+00> : vector<256x8xf32>
    %2 = tpu.matmul %1, %0, %cst {dimension_numbers = #tpu.dot_dimension_numbers<[1], [1], [0], [0], [0, 0, 1, 0], [], []>} : vector<256x32xf32>, vector<8x32xf32>, vector<256x8xf32> -> vector<256x8xf32>
    %c0_3 = arith.constant 0 : index
    %c0_4 = arith.constant 0 : index
    %3 = vector.load %arg3[%c0_3, %c0_4] : memref<256x1xf32, #tpu.memory_space<vmem>>, vector<256x1xf32>
    %4 = vector.broadcast %3 : vector<256x1xf32> to vector<256x8xf32>
    %5 = arith.addf %2, %4 : vector<256x8xf32>
    %cst_5 = arith.constant 0.000000e+00 : f32
    %6 = vector.broadcast %cst_5 : f32 to vector<256x8xf32>
    %7 = arith.maximumf %5, %6 : vector<256x8xf32>
    %c0_6 = arith.constant 0 : index
    %c0_7 = arith.constant 0 : index
    %8 = vector.load %arg4[%c0_6, %c0_7] : memref<256x256xf32, #tpu.memory_space<vmem>>, vector<256x256xf32>
    %cst_8 = arith.constant dense<0.000000e+00> : vector<256x8xf32>
    %9 = tpu.matmul %8, %7, %cst_8 {dimension_numbers = #tpu.dot_dimension_numbers<[1], [0], [0], [1], [0, 0, 1, 1], [], []>} : vector<256x256xf32>, vector<256x8xf32>, vector<256x8xf32> -> vector<256x8xf32>
    %c0_9 = arith.constant 0 : index
    %c0_10 = arith.constant 0 : index
    %10 = vector.load %arg5[%c0_9, %c0_10] : memref<256x1xf32, #tpu.memory_space<vmem>>, vector<256x1xf32>
    %11 = vector.broadcast %10 : vector<256x1xf32> to vector<256x8xf32>
    %12 = arith.addf %9, %11 : vector<256x8xf32>
    %cst_11 = arith.constant 0.000000e+00 : f32
    %13 = vector.broadcast %cst_11 : f32 to vector<256x8xf32>
    %14 = arith.maximumf %12, %13 : vector<256x8xf32>
    %c0_12 = arith.constant 0 : index
    %c0_13 = arith.constant 0 : index
    %15 = vector.load %arg6[%c0_12, %c0_13] : memref<256x256xf32, #tpu.memory_space<vmem>>, vector<256x256xf32>
    %cst_14 = arith.constant dense<0.000000e+00> : vector<256x8xf32>
    %16 = tpu.matmul %15, %14, %cst_14 {dimension_numbers = #tpu.dot_dimension_numbers<[1], [0], [0], [1], [0, 0, 1, 1], [], []>} : vector<256x256xf32>, vector<256x8xf32>, vector<256x8xf32> -> vector<256x8xf32>
    %c0_15 = arith.constant 0 : index
    %c0_16 = arith.constant 0 : index
    %17 = vector.load %arg7[%c0_15, %c0_16] : memref<256x1xf32, #tpu.memory_space<vmem>>, vector<256x1xf32>
    %18 = vector.broadcast %17 : vector<256x1xf32> to vector<256x8xf32>
    %19 = arith.addf %16, %18 : vector<256x8xf32>
    %cst_17 = arith.constant 0.000000e+00 : f32
    %20 = vector.broadcast %cst_17 : f32 to vector<256x8xf32>
    %21 = arith.maximumf %19, %20 : vector<256x8xf32>
    %c0_18 = arith.constant 0 : index
    %c0_19 = arith.constant 0 : index
    %22 = vector.load %arg8[%c0_18, %c0_19] : memref<256x1xf32, #tpu.memory_space<vmem>>, vector<256x1xf32>
    %23 = vector.broadcast %22 : vector<256x1xf32> to vector<256x8xf32>
    %24 = arith.mulf %21, %23 : vector<256x8xf32>
    %cst_20 = arith.constant dense<0.000000e+00> : vector<8xf32>
    %25 = vector.multi_reduction <add>, %24, %cst_20 [0] : vector<256x8xf32> to vector<8xf32>
    %26 = vector.shape_cast %25 : vector<8xf32> to vector<1x8xf32>
    %c0_21 = arith.constant 0 : index
    %c0_22 = arith.constant 0 : index
    %27 = vector.load %arg9[%c0_21, %c0_22] : memref<1x1xf32, #tpu.memory_space<vmem>>, vector<1x1xf32>
    %28 = vector.broadcast %27 : vector<1x1xf32> to vector<1x8xf32>
    %29 = arith.addf %26, %28 : vector<1x8xf32>
    %c0_23 = arith.constant 0 : index
    %c0_24 = arith.constant 0 : index
    %30 = vector.load %arg10[%c0_23, %c0_24] : memref<1x8xf32, #tpu.memory_space<vmem>>, vector<1x8xf32>
    tpu.vector_store %arg10[%c0_23, %c0_24], %29 {strides = array<i32>} : memref<1x8xf32, #tpu.memory_space<vmem>>, vector<1x8xf32>,
    return
  }
  func.func @transform_0(%arg0: i32) -> (i32, i32) {
    %c0_i32 = arith.constant 0 : i32
    %c0_i32_0 = arith.constant 0 : i32
    return %arg0, %c0_i32 : i32, i32
  }
  func.func @transform_1(%arg0: i32) -> (i32, i32) {
    %c0_i32 = arith.constant 0 : i32
    %c0_i32_0 = arith.constant 0 : i32
    %c0_i32_1 = arith.constant 0 : i32
    return %c0_i32, %c0_i32_0 : i32, i32
  }
  func.func @transform_2(%arg0: i32) -> (i32, i32) {
    %c0_i32 = arith.constant 0 : i32
    %c0_i32_0 = arith.constant 0 : i32
    %c0_i32_1 = arith.constant 0 : i32
    return %c0_i32, %c0_i32_0 : i32, i32
  }
  func.func @transform_3(%arg0: i32) -> (i32, i32) {
    %c0_i32 = arith.constant 0 : i32
    %c0_i32_0 = arith.constant 0 : i32
    %c0_i32_1 = arith.constant 0 : i32
    return %c0_i32, %c0_i32_0 : i32, i32
  }
  func.func @transform_4(%arg0: i32) -> (i32, i32) {
    %c0_i32 = arith.constant 0 : i32
    %c0_i32_0 = arith.constant 0 : i32
    %c0_i32_1 = arith.constant 0 : i32
    return %c0_i32, %c0_i32_0 : i32, i32
  }
  func.func @transform_5(%arg0: i32) -> (i32, i32) {
    %c0_i32 = arith.constant 0 : i32
    %c0_i32_0 = arith.constant 0 : i32
    %c0_i32_1 = arith.constant 0 : i32
    return %c0_i32, %c0_i32_0 : i32, i32
  }
  func.func @transform_6(%arg0: i32) -> (i32, i32) {
    %c0_i32 = arith.constant 0 : i32
    %c0_i32_0 = arith.constant 0 : i32
    %c0_i32_1 = arith.constant 0 : i32
    return %c0_i32, %c0_i32_0 : i32, i32
  }
  func.func @transform_7(%arg0: i32) -> (i32, i32) {
    %c0_i32 = arith.constant 0 : i32
    %c0_i32_0 = arith.constant 0 : i32
    %c0_i32_1 = arith.constant 0 : i32
    return %c0_i32, %c0_i32_0 : i32, i32
  }
  func.func @transform_8(%arg0: i32) -> (i32, i32) {
    %c0_i32 = arith.constant 0 : i32
    %c0_i32_0 = arith.constant 0 : i32
    %c0_i32_1 = arith.constant 0 : i32
    return %c0_i32, %c0_i32_0 : i32, i32
  }
  func.func @transform_9(%arg0: i32) -> (i32, i32) {
    %c0_i32 = arith.constant 0 : i32
    %c0_i32_0 = arith.constant 0 : i32
    return %c0_i32, %arg0 : i32, i32
  }
}

</mosaic_0001>

<bundles_post_ra>
// kernel: sil_critic_forward.1
= control target key start
LH: loop header
LB: loop body
LE: loop exit
PB: predicated region body
PF: predicated region fallthrough
CT: control target
= control target key end

     0   :  { %s3388_s0 = inlined_call_operand.vmem [shape: f32[8,32], index: 0, kind: input, shape index: {}]   ;;  %s3389_s1 = inlined_call_operand.vmem [shape: f32[256,32], index: 1, kind: input, shape index: {}]   ;;  %s3390_s2 = inlined_call_operand.vmem [shape: f32[256,1], index: 2, kind: input, shape index: {}]   ;;  %s3391_s3 = inlined_call_operand.vmem [shape: f32[256,256], index: 3, kind: input, shape index: {}]   ;;  %s3392_s4 = inlined_call_operand.vmem [shape: f32[256,1], index: 4, kind: input, shape index: {}]   ;;  %s3393_s5 = inlined_call_operand.vmem [shape: f32[256,256], index: 5, kind: input, shape index: {}]   ;;  %s3394_s6 = inlined_call_operand.vmem [shape: f32[256,1], index: 6, kind: input, shape index: {}]   ;;  %s3395_s7 = inlined_call_operand.vmem [shape: f32[256,1], index: 7, kind: input, shape index: {}]   ;;  %s3396_s8 = inlined_call_operand.<no memory space> [shape: f32[1,1], index: 8, kind: input, shape index: {}]   ;;  %s3397_s9 = inlined_call_operand.hbm [shape: f32[1,8], index: 9, kind: output, shape index: {}]  }
   0x1   :  { %v14_v0 = vstv %s3396_s8 }
   0x2   :  { %15 = vst [vmem:[#allocation2] sm:$0x1] %v14_v0 }
   0x3   :  { %v35_v1 = vld [vmem:[%s3388_s0] sm:$0xff]  ;;  %vm260_vm0 = vcmask 261120   ;;  %v70_v2 = vld [vmem:[%s3390_s2 + $0x10] sm:$0xff]  ;;  %v2205_v4 = vmov 0   ;;  %v37_v6 = vld [vmem:[%s3389_s1 + $0x8] sm:$0xff] }
   0x4   :  { %v68_v3 = vld [vmem:[%s3390_s2] sm:$0xff]  ;;  %2180 = vset.pattern.permute.xlu1 %v2205_v4  ;;  %2179 = vset.pattern.permute.xlu0 %v2205_v4  ;;  %v71_v7 = vld [vmem:[%s3390_s2 + $0x18] sm:$0xff]  ;;  %v69_v8 = vld [vmem:[%s3390_s2 + $0x8] sm:$0xff] }
   0x5   :  { %v36_v5 = vld [vmem:[%s3389_s1] sm:$0xff]  ;;  %2030 = vmatprep.subr.msk.mxu0 %vm260_vm0, %v35_v1  ;;  %112 = vperm.xlu1 %2180, %v70_v2   ;;  %v38_v9 = vld [vmem:[%s3389_s1 + $0x10] sm:$0xff]  ;;  %v39_v10 = vld [vmem:[%s3389_s1 + $0x18] sm:$0xff] }
   0x6   :  { %102 = vperm.xlu0 %2179, %v68_v3   ;;  %2031 = vmatpush3.xpose.msk.msra.mxu0 %vm260_vm0, %v35_v1  ;;  %v73_v11 = vld [vmem:[%s3390_s2 + $0x28] sm:$0xff]  ;;  %v72_v12 = vld [vmem:[%s3390_s2 + $0x20] sm:$0xff]  ;;  %v75_v15 = vld [vmem:[%s3390_s2 + $0x38] sm:$0xff] }
   0x7   :  { %2032 = vmatprep.mubr.msk.f32.mxu0 %vm260_vm0, %v36_v5  ;;  %v40_v13 = vld [vmem:[%s3389_s1 + $0x20] sm:$0xff]  ;;  %v41_v14 = vld [vmem:[%s3389_s1 + $0x28] sm:$0xff]  ;;  %v74_v16 = vld [vmem:[%s3390_s2 + $0x30] sm:$0xff] }
   0x8   :  { %v42_v17 = vld [vmem:[%s3389_s1 + $0x30] sm:$0xff]  ;;  %v43_v18 = vld [vmem:[%s3389_s1 + $0x38] sm:$0xff]  ;;  %v77_v19 = vld [vmem:[%s3390_s2 + $0x48] sm:$0xff] }
   0x9   :  { %2033 = vmatmul.mubr.msk.f32.vlgmr.msra.gmra.mrb[0].mxu0 %vm260_vm0, %v37_v6  ;;  %117 = vperm.xlu1 %2180, %v71_v7   ;;  %v76_v20 = vld [vmem:[%s3390_s2 + $0x40] sm:$0xff]  ;;  %v45_v22 = vld [vmem:[%s3389_s1 + $0x48] sm:$0xff]  ;;  %v79_v23 = vld [vmem:[%s3390_s2 + $0x58] sm:$0xff] }
   0xa   :  { %107 = vperm.xlu0 %2179, %v69_v8   ;;  %2035 = vmatprep.mubr.msk.f32.mxu0 %vm260_vm0, %v38_v9  ;;  %v44_v21 = vld [vmem:[%s3389_s1 + $0x40] sm:$0xff]  ;;  %v78_v24 = vld [vmem:[%s3390_s2 + $0x50] sm:$0xff]  ;;  %v47_v26 = vld [vmem:[%s3389_s1 + $0x58] sm:$0xff] }
   0xb   :  { %v46_v25 = vld [vmem:[%s3389_s1 + $0x50] sm:$0xff]  ;;  %v81_v27 = vld [vmem:[%s3390_s2 + $0x68] sm:$0xff]  ;;  %v80_v28 = vld [vmem:[%s3390_s2 + $0x60] sm:$0xff] }
   0xc   :  { %v48_v29 = vld [vmem:[%s3389_s1 + $0x60] sm:$0xff]  ;;  %v49_v30 = vld [vmem:[%s3389_s1 + $0x68] sm:$0xff]  ;;  %v83_v31 = vld [vmem:[%s3390_s2 + $0x78] sm:$0xff] }
   0xd   :  { %2036 = vmatmul.mubr.msk.f32.gmra.mrb[2].mxu0 %vm260_vm0, %v39_v10  ;;  %127 = vperm.xlu1 %2180, %v73_v11   ;;  %v82_v32 = vld [vmem:[%s3390_s2 + $0x70] sm:$0xff]  ;;  %v51_v34 = vld [vmem:[%s3389_s1 + $0x78] sm:$0xff]  ;;  %v85_v35 = vld [vmem:[%s3390_s2 + $0x88] sm:$0xff] }
   0xe   :  { %122 = vperm.xlu0 %2179, %v72_v12   ;;  %2038 = vmatprep.mubr.msk.f32.mxu0 %vm260_vm0, %v40_v13  ;;  %v50_v33 = vld [vmem:[%s3389_s1 + $0x70] sm:$0xff]  ;;  %v84_v36 = vld [vmem:[%s3390_s2 + $0x80] sm:$0xff]  ;;  %v53_v38 = vld [vmem:[%s3389_s1 + $0x88] sm:$0xff] }
   0xf   :  { %v52_v37 = vld [vmem:[%s3389_s1 + $0x80] sm:$0xff]  ;;  %v87_v39 = vld [vmem:[%s3390_s2 + $0x98] sm:$0xff]  ;;  %v86_v40 = vld [vmem:[%s3390_s2 + $0x90] sm:$0xff] }
  0x10   :  { %v54_v41 = vld [vmem:[%s3389_s1 + $0x90] sm:$0xff]  ;;  %v55_v42 = vld [vmem:[%s3389_s1 + $0x98] sm:$0xff]  ;;  %v89_v43 = vld [vmem:[%s3390_s2 + $0xa8] sm:$0xff] }
  0x11   :  { %2039 = vmatmul.mubr.msk.f32.gmra.mrb[4].mxu0 %vm260_vm0, %v41_v14  ;;  %137 = vperm.xlu1 %2180, %v75_v15  }
  0x12   :  { %132 = vperm.xlu0 %2179, %v74_v16   ;;  %2041 = vmatprep.mubr.msk.f32.mxu0 %vm260_vm0, %v42_v17 }
  0x15   :  { %2042 = vmatmul.mubr.msk.f32.gmra.mrb[6].mxu0 %vm260_vm0, %v43_v18  ;;  %147 = vperm.xlu1 %2180, %v77_v19  }
  0x16   :  { %142 = vperm.xlu0 %2179, %v76_v20   ;;  %2044 = vmatprep.mubr.msk.f32.mxu0 %vm260_vm0, %v44_v21 }
  0x19   :  { %2045 = vmatmul.mubr.msk.f32.gmra.mrb[8].mxu0 %vm260_vm0, %v45_v22  ;;  %157 = vperm.xlu1 %2180, %v79_v23  }
  0x1a   :  { %152 = vperm.xlu0 %2179, %v78_v24   ;;  %2047 = vmatprep.mubr.msk.f32.mxu0 %vm260_vm0, %v46_v25 }
  0x1d   :  { %2048 = vmatmul.mubr.msk.f32.gmra.mrb[10].mxu0 %vm260_vm0, %v47_v26  ;;  %167 = vperm.xlu1 %2180, %v81_v27  }
  0x1e   :  { %162 = vperm.xlu0 %2179, %v80_v28   ;;  %2050 = vmatprep.mubr.msk.f32.mxu0 %vm260_vm0, %v48_v29 }
  0x21   :  { %2051 = vmatmul.mubr.msk.f32.gmra.mrb[12].mxu0 %vm260_vm0, %v49_v30  ;;  %177 = vperm.xlu1 %2180, %v83_v31  }
  0x22   :  { %172 = vperm.xlu0 %2179, %v82_v32   ;;  %2053 = vmatprep.mubr.msk.f32.mxu0 %vm260_vm0, %v50_v33 }
  0x25   :  { %2054 = vmatmul.mubr.msk.f32.gmra.mrb[14].mxu0 %vm260_vm0, %v51_v34  ;;  %187 = vperm.xlu1 %2180, %v85_v35  }
  0x26   :  { %182 = vperm.xlu0 %2179, %v84_v36   ;;  %2056 = vmatprep.mubr.msk.f32.mxu0 %vm260_vm0, %v52_v37 }
  0x29   :  { %2057 = vmatmul.mubr.msk.f32.gmra.mrb[16].mxu0 %vm260_vm0, %v53_v38  ;;  %197 = vperm.xlu1 %2180, %v87_v39  }
  0x2a   :  { %192 = vperm.xlu0 %2179, %v86_v40   ;;  %2059 = vmatprep.mubr.msk.f32.mxu0 %vm260_vm0, %v54_v41 }
  0x2b   :  { %16 = vsyncpa [#allocation4], 0  ;;  %v88_v44 = vld [vmem:[%s3390_s2 + $0xa0] sm:$0xff]  ;;  %v57_v46 = vld [vmem:[%s3389_s1 + $0xa8] sm:$0xff]  ;;  %v2206_v21 = vmov 0.0|0.0   ;;  %vm1867_vm1 = vcmask 64512  }
  0x2c   :  { %v56_v45 = vld [vmem:[%s3389_s1 + $0xa0] sm:$0xff]  ;;  %v91_v47 = vld [vmem:[%s3390_s2 + $0xb8] sm:$0xff]  ;;  %v90_v48 = vld [vmem:[%s3390_s2 + $0xb0] sm:$0xff]  ;;  %2080 = vmatprep.subr.bf16.mxu1 %v2206_v21  ;;  %2128 = vmatprep.subr.bf16.mxu0 %v2206_v21  ;;  %vm1948_vm2 = vcmask 57344  }
  0x2d   :  { %2060 = vmatmul.mubr.msk.f32.gmra.mrb[18].mxu0 %vm260_vm0, %v55_v42  ;;  %207 = vperm.xlu1 %2180, %v89_v43   ;;  %v58_v49 = vld [vmem:[%s3389_s1 + $0xb0] sm:$0xff]  ;;  %v59_v50 = vld [vmem:[%s3389_s1 + $0xb8] sm:$0xff]  ;;  %v93_v51 = vld [vmem:[%s3390_s2 + $0xc8] sm:$0xff] }
  0x2e   :  { %202 = vperm.xlu0 %2179, %v88_v44   ;;  %2062 = vmatprep.mubr.msk.f32.mxu0 %vm260_vm0, %v56_v45  ;;  %v92_v52 = vld [vmem:[%s3390_s2 + $0xc0] sm:$0xff]  ;;  %v61_v54 = vld [vmem:[%s3389_s1 + $0xc8] sm:$0xff]  ;;  %v95_v55 = vld [vmem:[%s3390_s2 + $0xd8] sm:$0xff] }
  0x2f   :  { %v60_v53 = vld [vmem:[%s3389_s1 + $0xc0] sm:$0xff]  ;;  %v94_v56 = vld [vmem:[%s3390_s2 + $0xd0] sm:$0xff]  ;;  %v63_v58 = vld [vmem:[%s3389_s1 + $0xd8] sm:$0xff] }
  0x30   :  { %v62_v57 = vld [vmem:[%s3389_s1 + $0xd0] sm:$0xff]  ;;  %v97_v59 = vld [vmem:[%s3390_s2 + $0xe8] sm:$0xff]  ;;  %v96_v60 = vld [vmem:[%s3390_s2 + $0xe0] sm:$0xff] }
  0x31   :  { %2063 = vmatmul.mubr.msk.f32.gmra.mrb[20].mxu0 %vm260_vm0, %v57_v46  ;;  %217 = vperm.xlu1 %2180, %v91_v47   ;;  %v64_v61 = vld [vmem:[%s3389_s1 + $0xe0] sm:$0xff]  ;;  %v65_v62 = vld [vmem:[%s3389_s1 + $0xe8] sm:$0xff]  ;;  %v99_v63 = vld [vmem:[%s3390_s2 + $0xf8] sm:$0xff] }
  0x32   :  { %212 = vperm.xlu0 %2179, %v90_v48   ;;  %2065 = vmatprep.mubr.msk.f32.mxu0 %vm260_vm0, %v58_v49  ;;  %v98_v0 = vld [vmem:[%s3390_s2 + $0xf0] sm:$0xff]  ;;  %v67_v2 = vld [vmem:[%s3389_s1 + $0xf8] sm:$0xff]  ;;  %v682_v3 = vld [vmem:[%s3392_s4 + $0x8] sm:$0xff] }
  0x33   :  { %v66_v1 = vld [vmem:[%s3389_s1 + $0xf0] sm:$0xff]  ;;  %v681_v4 = vld [vmem:[%s3392_s4] sm:$0xff]  ;;  %v684_v5 = vld [vmem:[%s3392_s4 + $0x18] sm:$0xff] }
  0x34   :  { %v683_v6 = vld [vmem:[%s3392_s4 + $0x10] sm:$0xff]  ;;  %v686_v7 = vld [vmem:[%s3392_s4 + $0x28] sm:$0xff]  ;;  %v685_v8 = vld [vmem:[%s3392_s4 + $0x20] sm:$0xff] }
  0x35   :  { %2066 = vmatmul.mubr.msk.f32.gmra.mrb[22].mxu0 %vm260_vm0, %v59_v50  ;;  %227 = vperm.xlu1 %2180, %v93_v51   ;;  %v688_v9 = vld [vmem:[%s3392_s4 + $0x38] sm:$0xff]  ;;  %v687_v10 = vld [vmem:[%s3392_s4 + $0x30] sm:$0xff]  ;;  %v690_v11 = vld [vmem:[%s3392_s4 + $0x48] sm:$0xff] }
  0x36   :  { %222 = vperm.xlu0 %2179, %v92_v52   ;;  %2068 = vmatprep.mubr.msk.f32.mxu0 %vm260_vm0, %v60_v53  ;;  %v689_v12 = vld [vmem:[%s3392_s4 + $0x40] sm:$0xff]  ;;  %v692_v13 = vld [vmem:[%s3392_s4 + $0x58] sm:$0xff]  ;;  %v691_v14 = vld [vmem:[%s3392_s4 + $0x50] sm:$0xff] }
  0x37   :  { %v694_v15 = vld [vmem:[%s3392_s4 + $0x68] sm:$0xff]  ;;  %v693_v16 = vld [vmem:[%s3392_s4 + $0x60] sm:$0xff]  ;;  %v696_v17 = vld [vmem:[%s3392_s4 + $0x78] sm:$0xff] }
  0x38   :  { %v695_v18 = vld [vmem:[%s3392_s4 + $0x70] sm:$0xff]  ;;  %v698_v19 = vld [vmem:[%s3392_s4 + $0x88] sm:$0xff]  ;;  %v697_v20 = vld [vmem:[%s3392_s4 + $0x80] sm:$0xff] }
  0x39   :  { %2069 = vmatmul.mubr.msk.f32.gmra.mrb[24].mxu0 %vm260_vm0, %v61_v54  ;;  %237 = vperm.xlu1 %2180, %v95_v55   ;;  %v700_v22 = vld [vmem:[%s3392_s4 + $0x98] sm:$0xff]  ;;  %v699_v23 = vld [vmem:[%s3392_s4 + $0x90] sm:$0xff]  ;;  %v702_v24 = vld [vmem:[%s3392_s4 + $0xa8] sm:$0xff] }
  0x3a   :  { %232 = vperm.xlu0 %2179, %v94_v56   ;;  %2071 = vmatprep.mubr.msk.f32.mxu0 %vm260_vm0, %v62_v57  ;;  %v701_v25 = vld [vmem:[%s3392_s4 + $0xa0] sm:$0xff]  ;;  %v704_v26 = vld [vmem:[%s3392_s4 + $0xb8] sm:$0xff]  ;;  %v703_v27 = vld [vmem:[%s3392_s4 + $0xb0] sm:$0xff] }
  0x3b   :  { %v706_v28 = vld [vmem:[%s3392_s4 + $0xc8] sm:$0xff]  ;;  %v705_v29 = vld [vmem:[%s3392_s4 + $0xc0] sm:$0xff]  ;;  %v708_v30 = vld [vmem:[%s3392_s4 + $0xd8] sm:$0xff] }
  0x3c   :  { %v707_v31 = vld [vmem:[%s3392_s4 + $0xd0] sm:$0xff]  ;;  %v710_v32 = vld [vmem:[%s3392_s4 + $0xe8] sm:$0xff]  ;;  %v709_v33 = vld [vmem:[%s3392_s4 + $0xe0] sm:$0xff] }
  0x3d   :  { %2072 = vmatmul.mubr.msk.f32.gmra.mrb[26].mxu0 %vm260_vm0, %v63_v58  ;;  %247 = vperm.xlu1 %2180, %v97_v59   ;;  %v712_v34 = vld [vmem:[%s3392_s4 + $0xf8] sm:$0xff]  ;;  %v711_v35 = vld [vmem:[%s3392_s4 + $0xf0] sm:$0xff]  ;;  %v1195_v36 = vld [vmem:[%s3394_s6 + $0x8] sm:$0xff] }
  0x3e   :  { %242 = vperm.xlu0 %2179, %v96_v60   ;;  %2074 = vmatprep.mubr.msk.f32.mxu0 %vm260_vm0, %v64_v61  ;;  %v1194_v37 = vld [vmem:[%s3394_s6] sm:$0xff]  ;;  %v1197_v38 = vld [vmem:[%s3394_s6 + $0x18] sm:$0xff]  ;;  %v1196_v39 = vld [vmem:[%s3394_s6 + $0x10] sm:$0xff] }
  0x3f   :  { %v1199_v40 = vld [vmem:[%s3394_s6 + $0x28] sm:$0xff]  ;;  %v1198_v41 = vld [vmem:[%s3394_s6 + $0x20] sm:$0xff]  ;;  %v1201_v42 = vld [vmem:[%s3394_s6 + $0x38] sm:$0xff] }
  0x40   :  { %v1200_v43 = vld [vmem:[%s3394_s6 + $0x30] sm:$0xff]  ;;  %v1203_v44 = vld [vmem:[%s3394_s6 + $0x48] sm:$0xff]  ;;  %v1202_v45 = vld [vmem:[%s3394_s6 + $0x40] sm:$0xff] }
  0x41   :  { %2075 = vmatmul.mubr.msk.f32.gmra.mrb[28].mxu0 %vm260_vm0, %v65_v62  ;;  %257 = vperm.xlu1 %2180, %v99_v63   ;;  %v1205_v46 = vld [vmem:[%s3394_s6 + $0x58] sm:$0xff]  ;;  %v1204_v47 = vld [vmem:[%s3394_s6 + $0x50] sm:$0xff]  ;;  %v1207_v48 = vld [vmem:[%s3394_s6 + $0x68] sm:$0xff] }
  0x42   :  { %252 = vperm.xlu0 %2179, %v98_v0   ;;  %2077 = vmatprep.mubr.msk.f32.mxu0 %vm260_vm0, %v66_v1  ;;  %v1206_v49 = vld [vmem:[%s3394_s6 + $0x60] sm:$0xff]  ;;  %v1209_v50 = vld [vmem:[%s3394_s6 + $0x78] sm:$0xff]  ;;  %v1208_v51 = vld [vmem:[%s3394_s6 + $0x70] sm:$0xff] }
  0x43   :  { %v618_v52 = vld [vmem:[%s3391_s3 + $0x8] sm:$0xff]  ;;  %v1210_v54 = vld [vmem:[%s3394_s6 + $0x80] sm:$0xff]  ;;  %v1213_v55 = vld [vmem:[%s3394_s6 + $0x98] sm:$0xff] }
  0x44   :  { %v1211_v53 = vld [vmem:[%s3394_s6 + $0x88] sm:$0xff]  ;;  %937 = vmatprep.mubr.f32.mxu1 %v618_v52  ;;  %v1212_v56 = vld [vmem:[%s3394_s6 + $0x90] sm:$0xff]  ;;  %v1214_v58 = vld [vmem:[%s3394_s6 + $0xa0] sm:$0xff] }
  0x45   :  { %2078 = vmatmul.mubr.msk.f32.gmra.mrb[30].mxu0 %vm260_vm0, %v67_v2  ;;  %720 = vperm.xlu1 %2180, %v682_v3   ;;  %v1215_v57 = vld [vmem:[%s3394_s6 + $0xa8] sm:$0xff]  ;;  %v1217_v61 = vld [vmem:[%s3394_s6 + $0xb8] sm:$0xff]  ;;  %v1216_v62 = vld [vmem:[%s3394_s6 + $0xb0] sm:$0xff] }
  0x46   :  { %715 = vperm.xlu0 %2179, %v681_v4   ;;  %v1219_v0 = vld [vmem:[%s3394_s6 + $0xc8] sm:$0xff]  ;;  %v1218_v2 = vld [vmem:[%s3394_s6 + $0xc0] sm:$0xff]  ;;  %v1221_v3 = vld [vmem:[%s3394_s6 + $0xd8] sm:$0xff] }
  0x47   :  { %v1220_v4 = vld [vmem:[%s3394_s6 + $0xd0] sm:$0xff]  ;;  %v1663_v52 = vld [vmem:[%s3395_s7 + $0xa0] sm:$0xff] }
  0x49   :  { %730 = vperm.xlu1 %2180, %v684_v5  }
  0x4a   :  { %725 = vperm.xlu0 %2179, %v683_v6  }
  0x4d   :  { %740 = vperm.xlu1 %2180, %v686_v7   ;;  %v1643_v7 = vld [vmem:[%s3395_s7] sm:$0xff] }
  0x4e   :  { %735 = vperm.xlu0 %2179, %v685_v8   ;;  %v1222_v8 = vld [vmem:[%s3394_s6 + $0xe0] sm:$0xff] }
  0x51   :  { %750 = vperm.xlu1 %2180, %v688_v9  }
  0x52   :  { %745 = vperm.xlu0 %2179, %v687_v10   ;;  %v1645_v10 = vld [vmem:[%s3395_s7 + $0x10] sm:$0xff] }
  0x55   :  { %760 = vperm.xlu1 %2180, %v690_v11  }
  0x56   :  { %755 = vperm.xlu0 %2179, %v689_v12   ;;  %v1644_v12 = vld [vmem:[%s3395_s7 + $0x8] sm:$0xff] }
  0x59   :  { %770 = vperm.xlu1 %2180, %v692_v13   ;;  %v1647_v13 = vld [vmem:[%s3395_s7 + $0x20] sm:$0xff] }
  0x5a   :  { %765 = vperm.xlu0 %2179, %v691_v14   ;;  %v1646_v14 = vld [vmem:[%s3395_s7 + $0x18] sm:$0xff] }
  0x5d   :  { %780 = vperm.xlu1 %2180, %v694_v15  }
  0x5e   :  { %775 = vperm.xlu0 %2179, %v693_v16  }
  0x61   :  { %790 = vperm.xlu1 %2180, %v696_v17   ;;  %v1649_v17 = vld [vmem:[%s3395_s7 + $0x30] sm:$0xff] }
  0x62   :  { %785 = vperm.xlu0 %2179, %v695_v18   ;;  %v1648_v18 = vld [vmem:[%s3395_s7 + $0x28] sm:$0xff] }
  0x65   :  { %800 = vperm.xlu1 %2180, %v698_v19  }
  0x66   :  { %795 = vperm.xlu0 %2179, %v697_v20   ;;  %v1651_v20 = vld [vmem:[%s3395_s7 + $0x40] sm:$0xff] }
  0x69   :  { %810 = vperm.xlu1 %2180, %v700_v22  }
  0x6a   :  { %805 = vperm.xlu0 %2179, %v699_v23   ;;  %v1650_v23 = vld [vmem:[%s3395_s7 + $0x38] sm:$0xff] }
  0x6d   :  { %820 = vperm.xlu1 %2180, %v702_v24   ;;  %v1653_v24 = vld [vmem:[%s3395_s7 + $0x50] sm:$0xff] }
  0x6e   :  { %815 = vperm.xlu0 %2179, %v701_v25   ;;  %v1652_v25 = vld [vmem:[%s3395_s7 + $0x48] sm:$0xff] }
  0x71   :  { %830 = vperm.xlu1 %2180, %v704_v26  }
  0x72   :  { %825 = vperm.xlu0 %2179, %v703_v27  }
  0x75   :  { %840 = vperm.xlu1 %2180, %v706_v28   ;;  %v1655_v28 = vld [vmem:[%s3395_s7 + $0x60] sm:$0xff] }
  0x76   :  { %835 = vperm.xlu0 %2179, %v705_v29   ;;  %v1654_v29 = vld [vmem:[%s3395_s7 + $0x58] sm:$0xff] }
  0x79   :  { %850 = vperm.xlu1 %2180, %v708_v30  }
  0x7a   :  { %845 = vperm.xlu0 %2179, %v707_v31   ;;  %v1657_v31 = vld [vmem:[%s3395_s7 + $0x70] sm:$0xff] }
  0x7d   :  { %860 = vperm.xlu1 %2180, %v710_v32  }
  0x7e   :  { %855 = vperm.xlu0 %2179, %v709_v33   ;;  %v1656_v33 = vld [vmem:[%s3395_s7 + $0x68] sm:$0xff] }
  0x81   :  { %870 = vperm.xlu1 %2180, %v712_v34   ;;  %v1659_v34 = vld [vmem:[%s3395_s7 + $0x80] sm:$0xff] }
  0x82   :  { %865 = vperm.xlu0 %2179, %v711_v35   ;;  %v1658_v35 = vld [vmem:[%s3395_s7 + $0x78] sm:$0xff] }
  0x84   :  { %v2659_v60 = vpop.permute.xlu1 %112 }
  0x85   :  { %1233 = vperm.xlu1 %2180, %v1195_v36   ;;  %v2657_v59 = vpop.permute.xlu0 %102 }
  0x86   :  { %1228 = vperm.xlu0 %2179, %v1194_v37  }
  0x88   :  { %v2670_v1 = vpop.permute.xlu1 %117 }
  0x89   :  { %1243 = vperm.xlu1 %2180, %v1197_v38   ;;  %v108_v63 = vpop.permute.xlu0 %107 }
  0x8a   :  { %1238 = vperm.xlu0 %2179, %v1196_v39  }
  0x8c   :  { %v2683_v6 = vpop.permute.xlu1 %127 }
  0x8d   :  { %1253 = vperm.xlu1 %2180, %v1199_v40   ;;  %v2681_v5 = vpop.permute.xlu0 %122 }
  0x8e   :  { %1248 = vperm.xlu0 %2179, %v1198_v41  }
  0x90   :  { %v2696_v11 = vpop.permute.xlu1 %137 }
  0x91   :  { %1263 = vperm.xlu1 %2180, %v1201_v42   ;;  %v2691_v9 = vpop.permute.xlu0 %132  ;;  %v1661_v42 = vld [vmem:[%s3395_s7 + $0x90] sm:$0xff] }
  0x92   :  { %1258 = vperm.xlu0 %2179, %v1200_v43  }
  0x94   :  { %v2709_v16 = vpop.permute.xlu1 %147 }
  0x95   :  { %1273 = vperm.xlu1 %2180, %v1203_v44   ;;  %v2707_v15 = vpop.permute.xlu0 %142  ;;  %v1660_v44 = vld [vmem:[%s3395_s7 + $0x88] sm:$0xff] }
  0x96   :  { %1268 = vperm.xlu0 %2179, %v1202_v45  }
  0x98   :  { %v2722_v22 = vpop.permute.xlu1 %157 }
  0x99   :  { %1283 = vperm.xlu1 %2180, %v1205_v46   ;;  %v2717_v19 = vpop.permute.xlu0 %152 }
  0x9a   :  { %1278 = vperm.xlu0 %2179, %v1204_v47  }
  0x9c   :  { %v2735_v27 = vpop.permute.xlu1 %167 }
  0x9d   :  { %1293 = vperm.xlu1 %2180, %v1207_v48   ;;  %v2733_v26 = vpop.permute.xlu0 %162 }
  0x9e   :  { %1288 = vperm.xlu0 %2179, %v1206_v49  }
  0xa0   :  { %v2748_v32 = vpop.permute.xlu1 %177 }
  0xa1   :  { %1303 = vperm.xlu1 %2180, %v1209_v50   ;;  %v2743_v30 = vpop.permute.xlu0 %172 }
  0xa2   :  { %1298 = vperm.xlu0 %2179, %v1208_v51  }
  0xa4   :  { %v2761_v38 = vpop.permute.xlu1 %187 }
  0xa5   :  { %1313 = vperm.xlu1 %2180, %v1211_v53   ;;  %v2759_v36 = vpop.permute.xlu0 %182 }
  0xa6   :  { %1308 = vperm.xlu0 %2179, %v1210_v54  }
  0xa8   :  { %v2777_v53 = vpop.permute.xlu1 %197 }
  0xa9   :  { %1323 = vperm.xlu1 %2180, %v1213_v55   ;;  %v2771_v49 = vpop.permute.xlu0 %192  ;;  %v1662_v55 = vld [vmem:[%s3395_s7 + $0x98] sm:$0xff] }
  0xaa   :  { %1318 = vperm.xlu0 %2179, %v1212_v56  }
  0xad   :  { %1333 = vperm.xlu1 %2180, %v1215_v57  }
  0xae   :  { %1328 = vperm.xlu0 %2179, %v1214_v58  }
  0xb1   :  { %1343 = vperm.xlu1 %2180, %v1217_v61  }
  0xb2   :  { %1338 = vperm.xlu0 %2179, %v1216_v62   ;;  %v1665_v62 = vld [vmem:[%s3395_s7 + $0xb0] sm:$0xff] }
  0xb5   :  { %1353 = vperm.xlu1 %2180, %v1219_v0   ;;  %v1664_v0 = vld [vmem:[%s3395_s7 + $0xa8] sm:$0xff] }
  0xb6   :  { %1348 = vperm.xlu0 %2179, %v1218_v2  }
  0xb9   :  { %1363 = vperm.xlu1 %2180, %v1221_v3  }
  0xba   :  { %1358 = vperm.xlu0 %2179, %v1220_v4   ;;  %v2793_v4 = vpop.permute.xlu1 %207 }
  0xbd   :  { %1677 = vperm.xlu1 %2180, %v1643_v7  }
  0xbe   :  { %1368 = vperm.xlu0 %2179, %v1222_v8  }
  0xc1   :  { %1687 = vperm.xlu1 %2180, %v1645_v10   ;;  %v1667_v10 = vld [vmem:[%s3395_s7 + $0xc0] sm:$0xff] }
  0xc2   :  { %1682 = vperm.xlu0 %2179, %v1644_v12  }
  0xc5   :  { %1697 = vperm.xlu1 %2180, %v1647_v13   ;;  %v1666_v13 = vld [vmem:[%s3395_s7 + $0xb8] sm:$0xff] }
  0xc6   :  { %1692 = vperm.xlu0 %2179, %v1646_v14  }
  0xc9   :  { %1707 = vperm.xlu1 %2180, %v1649_v17  }
  0xca   :  { %1702 = vperm.xlu0 %2179, %v1648_v18  }
  0xcd   :  { %1717 = vperm.xlu1 %2180, %v1651_v20  }
  0xce   :  { %1712 = vperm.xlu0 %2179, %v1650_v23  }
  0xd1   :  { %1727 = vperm.xlu1 %2180, %v1653_v24   ;;  %v1669_v24 = vld [vmem:[%s3395_s7 + $0xd0] sm:$0xff] }
  0xd2   :  { %1722 = vperm.xlu0 %2179, %v1652_v25   ;;  %v2812_v25 = vpop.permute.xlu1 %217 }
  0xd5   :  { %1737 = vperm.xlu1 %2180, %v1655_v28  }
  0xd6   :  { %1732 = vperm.xlu0 %2179, %v1654_v29  }
  0xd9   :  { %1747 = vperm.xlu1 %2180, %v1657_v31  }
  0xda   :  { %1742 = vperm.xlu0 %2179, %v1656_v33  }
  0xdc   :  { %v2034_v37 = vpop.f32.mrb[0].mxu0 }
  0xdd   :  { %v432_v39 = vadd.f32 %v2034_v37, %v108_v63  ;;  %v426_v40 = vpop.f32.mrb[1].mxu0  ;;  %1757 = vperm.xlu1 %2180, %v1659_v34   ;;  %v1670_v37 = vld [vmem:[%s3395_s7 + $0xd8] sm:$0xff] }
  0xde   :  { %v427_v41 = vadd.f32 %v426_v40, %v2657_v59  ;;  %1752 = vperm.xlu0 %2179, %v1658_v35   ;;  %v1223_v40 = vld [vmem:[%s3394_s6 + $0xe8] sm:$0xff] }
  0xdf   :  { %v586_v43 = vmax.f32 %v432_v39, 0.0 }
  0xe0   :  { %v585_v45 = vmax.f32 %v427_v41, 0.0  ;;  %v2037_v46 = vpop.f32.mrb[2].mxu0 }
  0xe1   :  { %v442_v47 = vadd.f32 %v2037_v46, %v2670_v1  ;;  %v436_v48 = vpop.f32.mrb[3].mxu0  ;;  %1767 = vperm.xlu1 %2180, %v1661_v42   ;;  %v2791_v1 = vpop.permute.xlu0 %202 }
  0xe2   :  { %v437_v50 = vadd.f32 %v436_v48, %v2659_v60  ;;  %1762 = vperm.xlu0 %2179, %v1660_v44   ;;  %v2081_v51 = vpack.c.bf16 %v586_v43, %v585_v45  ;;  %v2828_v43 = vpop.permute.xlu1 %227 }
  0xe3   :  { %v588_v54 = vmax.f32 %v442_v47, 0.0  ;;  %v1671_v47 = vld [vmem:[%s3395_s7 + $0xe0] sm:$0xff] }
  0xe4   :  { %v587_v56 = vmax.f32 %v437_v50, 0.0  ;;  %v2040_v57 = vpop.f32.mrb[4].mxu0  ;;  %2082 = vmatpush1.bf16.msra.mxu1 %v2081_v51  ;;  %v1224_v50 = vld [vmem:[%s3394_s6 + $0xf0] sm:$0xff] }
  0xe5   :  { %v452_v58 = vadd.f32 %v2040_v57, %v2683_v6  ;;  %v446_v59 = vpop.f32.mrb[5].mxu0  ;;  %1777 = vperm.xlu1 %2180, %v1663_v52   ;;  %2083 = vmatprep.subr.bf16.mxu1 %v2206_v21  ;;  %v1672_v57 = vld [vmem:[%s3395_s7 + $0xe8] sm:$0xff] }
  0xe6   :  { %v2084_v60 = vpack.c.bf16 %v588_v54, %v587_v56  ;;  %v447_v61 = vadd.f32 %v446_v59, %v2681_v5  ;;  %1772 = vperm.xlu0 %2179, %v1662_v55  }
  0xe7   :  { %v590_v63 = vmax.f32 %v452_v58, 0.0  ;;  %v238_v58 = vpop.permute.xlu1 %237 }
  0xe8   :  { %v589_v2 = vmax.f32 %v447_v61, 0.0  ;;  %v2043_v3 = vpop.f32.mrb[6].mxu0  ;;  %2085 = vmatpush1.bf16.msra.mxu1 %v2084_v60 }
  0xe9   :  { %v462_v6 = vadd.f32 %v2043_v3, %v2696_v11  ;;  %v456_v5 = vpop.f32.mrb[7].mxu0  ;;  %1787 = vperm.xlu1 %2180, %v1665_v62   ;;  %2086 = vmatprep.subr.bf16.mxu1 %v2206_v21 }
  0xea   :  { %v2087_v7 = vpack.c.bf16 %v590_v63, %v589_v2  ;;  %v457_v8 = vadd.f32 %v456_v5, %v2691_v9  ;;  %1782 = vperm.xlu0 %2179, %v1664_v0   ;;  %v2806_v9 = vpop.permute.xlu0 %212  ;;  %v1674_v2 = vld [vmem:[%s3395_s7 + $0xf8] sm:$0xff] }
  0xeb   :  { %v592_v12 = vmax.f32 %v462_v6, 0.0  ;;  %v1673_v6 = vld [vmem:[%s3395_s7 + $0xf0] sm:$0xff] }
  0xec   :  { %v591_v14 = vmax.f32 %v457_v8, 0.0  ;;  %v2046_v17 = vpop.f32.mrb[8].mxu0  ;;  %2088 = vmatpush1.bf16.msra.mxu1 %v2087_v7  ;;  %v248_v8 = vpop.permute.xlu1 %247 }
  0xed   :  { %v472_v11 = vadd.f32 %v2046_v17, %v2709_v16  ;;  %v466_v18 = vpop.f32.mrb[9].mxu0  ;;  %1797 = vperm.xlu1 %2180, %v1667_v10   ;;  %2089 = vmatprep.subr.bf16.mxu1 %v2206_v21  ;;  %v1668_v16 = vld [vmem:[%s3395_s7 + $0xc8] sm:$0xff]  ;;  %v1937_v17 = vld [vmem:[#allocation2] sm:$0x1] }
  0xee   :  { %v2090_v20 = vpack.c.bf16 %v592_v12, %v591_v14  ;;  %v467_v23 = vadd.f32 %v466_v18, %v2707_v15  ;;  %1792 = vperm.xlu0 %2179, %v1666_v13   ;;  %v2826_v41 = vpop.permute.xlu0 %222 }
  0xef   :  { %v594_v28 = vmax.f32 %v472_v11, 0.0 }
  0xf0   :  { %v593_v29 = vmax.f32 %v467_v23, 0.0  ;;  %v2049_v31 = vpop.f32.mrb[10].mxu0  ;;  %2091 = vmatpush1.bf16.msra.mxu1 %v2090_v20 }
  0xf1   :  { %v482_v33 = vadd.f32 %v2049_v31, %v2722_v22  ;;  %v476_v34 = vpop.f32.mrb[11].mxu0  ;;  %1807 = vperm.xlu1 %2180, %v1669_v24   ;;  %2092 = vmatprep.subr.bf16.mxu1 %v2206_v21 }
  0xf2   :  { %v2093_v15 = vpack.c.bf16 %v594_v28, %v593_v29  ;;  %v477_v35 = vadd.f32 %v476_v34, %v2717_v19  ;;  %1802 = vperm.xlu0 %2179, %v1668_v16  }
  0xf3   :  { %v596_v39 = vmax.f32 %v482_v33, 0.0 }
  0xf4   :  { %v595_v22 = vmax.f32 %v477_v35, 0.0  ;;  %v2052_v42 = vpop.f32.mrb[12].mxu0  ;;  %2094 = vmatpush1.bf16.msra.mxu1 %v2093_v15 }
  0xf5   :  { %v492_v44 = vadd.f32 %v2052_v42, %v2735_v27  ;;  %v486_v19 = vpop.f32.mrb[13].mxu0  ;;  %1812 = vperm.xlu1 %2180, %v1670_v37   ;;  %2095 = vmatprep.subr.bf16.mxu1 %v2206_v21 }
  0xf6   :  { %v2096_v45 = vpack.c.bf16 %v596_v39, %v595_v22  ;;  %v487_v46 = vadd.f32 %v486_v19, %v2733_v26  ;;  %1373 = vperm.xlu0 %2179, %v1223_v40   ;;  %v2841_v26 = vpop.permute.xlu0 %232 }
  0xf7   :  { %v598_v48 = vmax.f32 %v492_v44, 0.0 }
  0xf8   :  { %v597_v51 = vmax.f32 %v487_v46, 0.0  ;;  %v2055_v52 = vpop.f32.mrb[14].mxu0  ;;  %2097 = vmatpush1.bf16.msra.mxu1 %v2096_v45 }
  0xf9   :  { %v502_v27 = vadd.f32 %v2055_v52, %v2748_v32  ;;  %v496_v54 = vpop.f32.mrb[15].mxu0  ;;  %1817 = vperm.xlu1 %2180, %v1671_v47   ;;  %2098 = vmatprep.subr.bf16.mxu1 %v2206_v21  ;;  %v1225_v32 = vld [vmem:[%s3394_s6 + $0xf8] sm:$0xff] }
  0xfa   :  { %v2099_v55 = vpack.c.bf16 %v598_v48, %v597_v51  ;;  %v497_v56 = vadd.f32 %v496_v54, %v2743_v30  ;;  %1378 = vperm.xlu0 %2179, %v1224_v50   ;;  %v243_v5 = vpop.permute.xlu0 %242  ;;  %v258_v54 = vpop.permute.xlu1 %257 }
  0xfb   :  { %v600_v59 = vmax.f32 %v502_v27, 0.0 }
  0xfc   :  { %v599_v60 = vmax.f32 %v497_v56, 0.0  ;;  %v2058_v61 = vpop.f32.mrb[16].mxu0  ;;  %2100 = vmatpush1.bf16.msra.mxu1 %v2099_v55 }
  0xfd   :  { %v512_v62 = vadd.f32 %v2058_v61, %v2761_v38  ;;  %v506_v63 = vpop.f32.mrb[17].mxu0  ;;  %1822 = vperm.xlu1 %2180, %v1672_v57   ;;  %2101 = vmatprep.subr.bf16.mxu1 %v2206_v21 }
  0xfe   :  { %v2102_v30 = vpack.c.bf16 %v600_v59, %v599_v60  ;;  %v507_v0 = vadd.f32 %v506_v63, %v2759_v36  ;;  %1383 = vperm.xlu0 %2179, %v1225_v32   ;;  %v253_v24 = vpop.permute.xlu0 %252  ;;  %v620_v63 = vld [vmem:[%s3391_s3 + $0x18] sm:$0xff] }
  0xff   :  { %v602_v3 = vmax.f32 %v512_v62, 0.0  ;;  %v617_v62 = vld [vmem:[%s3391_s3] sm:$0xff] }
 0x100   :  { %v601_v7 = vmax.f32 %v507_v0, 0.0  ;;  %v2061_v38 = vpop.f32.mrb[18].mxu0  ;;  %2103 = vmatpush1.bf16.msra.mxu1 %v2102_v30  ;;  %v619_v30 = vld [vmem:[%s3391_s3 + $0x10] sm:$0xff]  ;;  %v622_v0 = vld [vmem:[%s3391_s3 + $0x28] sm:$0xff] }
 0x101   :  { %v522_v10 = vadd.f32 %v2061_v38, %v2777_v53  ;;  %v516_v12 = vpop.f32.mrb[19].mxu0  ;;  %1832 = vperm.xlu1 %2180, %v1674_v2   ;;  %2104 = vmatprep.subr.bf16.mxu1 %v2206_v21  ;;  %v621_v2 = vld [vmem:[%s3391_s3 + $0x20] sm:$0xff]  ;;  %v628_v38 = vld [vmem:[%s3391_s3 + $0x58] sm:$0xff] }
 0x102   :  { %v2105_v36 = vpack.c.bf16 %v602_v3, %v601_v7  ;;  %v517_v13 = vadd.f32 %v516_v12, %v2771_v49  ;;  %1827 = vperm.xlu0 %2179, %v1673_v6   ;;  %v624_v3 = vld [vmem:[%s3391_s3 + $0x38] sm:$0xff]  ;;  %v623_v6 = vld [vmem:[%s3391_s3 + $0x30] sm:$0xff]  ;;  %v625_v7 = vld [vmem:[%s3391_s3 + $0x40] sm:$0xff] }
 0x103   :  { %v604_v14 = vmax.f32 %v522_v10, 0.0  ;;  %v630_v10 = vld [vmem:[%s3391_s3 + $0x68] sm:$0xff]  ;;  %v629_v12 = vld [vmem:[%s3391_s3 + $0x60] sm:$0xff] }
 0x104   :  { %v603_v11 = vmax.f32 %v517_v13, 0.0  ;;  %v2064_v18 = vpop.f32.mrb[20].mxu0  ;;  %2106 = vmatpush1.bf16.msra.mxu1 %v2105_v36  ;;  %v632_v36 = vld [vmem:[%s3391_s3 + $0x78] sm:$0xff]  ;;  %v631_v13 = vld [vmem:[%s3391_s3 + $0x70] sm:$0xff] }
 0x105   :  { %v532_v20 = vadd.f32 %v2064_v18, %v2793_v4  ;;  %v526_v23 = vpop.f32.mrb[21].mxu0  ;;  %2107 = vmatprep.subr.bf16.mxu1 %v2206_v21  ;;  %v635_v18 = vld [vmem:[%s3391_s3 + $0x90] sm:$0xff] }
 0x106   :  { %v2108_v53 = vpack.c.bf16 %v604_v14, %v603_v11  ;;  %v527_v28 = vadd.f32 %v526_v23, %v2791_v1  ;;  %1940 = vperm.xlu0 %2179, %v1937_v17   ;;  %v634_v14 = vld [vmem:[%s3391_s3 + $0x88] sm:$0xff]  ;;  %v633_v17 = vld [vmem:[%s3391_s3 + $0x80] sm:$0xff]  ;;  %v636_v11 = vld [vmem:[%s3391_s3 + $0x98] sm:$0xff] }
 0x107   :  { %v606_v16 = vmax.f32 %v532_v20, 0.0  ;;  %v638_v20 = vld [vmem:[%s3391_s3 + $0xa8] sm:$0xff]  ;;  %v637_v23 = vld [vmem:[%s3391_s3 + $0xa0] sm:$0xff] }
 0x108   :  { %v605_v29 = vmax.f32 %v527_v28, 0.0  ;;  %v2067_v31 = vpop.f32.mrb[22].mxu0  ;;  %2109 = vmatpush1.bf16.msra.mxu1 %v2108_v53  ;;  %v639_v53 = vld [vmem:[%s3391_s3 + $0xb0] sm:$0xff]  ;;  %v642_v28 = vld [vmem:[%s3391_s3 + $0xc8] sm:$0xff] }
 0x109   :  { %v542_v49 = vadd.f32 %v2067_v31, %v2812_v25  ;;  %v536_v33 = vpop.f32.mrb[23].mxu0  ;;  %2110 = vmatprep.subr.bf16.mxu1 %v2206_v21  ;;  %v643_v31 = vld [vmem:[%s3391_s3 + $0xd0] sm:$0xff] }
 0x10a   :  { %v2111_v34 = vpack.c.bf16 %v606_v16, %v605_v29  ;;  %v537_v4 = vadd.f32 %v536_v33, %v2806_v9  ;;  %v641_v16 = vld [vmem:[%s3391_s3 + $0xc0] sm:$0xff]  ;;  %v644_v29 = vld [vmem:[%s3391_s3 + $0xd8] sm:$0xff] }
 0x10b   :  { %v608_v15 = vmax.f32 %v542_v49, 0.0  ;;  %v646_v49 = vld [vmem:[%s3391_s3 + $0xe8] sm:$0xff]  ;;  %v645_v33 = vld [vmem:[%s3391_s3 + $0xe0] sm:$0xff] }
 0x10c   :  { %v607_v35 = vmax.f32 %v537_v4, 0.0  ;;  %v2070_v37 = vpop.f32.mrb[24].mxu0  ;;  %2112 = vmatpush1.bf16.msra.mxu1 %v2111_v34  ;;  %v648_v34 = vld [vmem:[%s3391_s3 + $0xf8] sm:$0xff]  ;;  %v647_v4 = vld [vmem:[%s3391_s3 + $0xf0] sm:$0xff] }
 0x10d   :  { %v552_v39 = vadd.f32 %v2070_v37, %v2828_v43  ;;  %v546_v1 = vpop.f32.mrb[25].mxu0  ;;  %2113 = vmatprep.subr.bf16.mxu1 %v2206_v21  ;;  %v652_v37 = vld [vmem:[%s3391_s3 + $0x118] sm:$0xff] }
 0x10e   :  { %v2114_v40 = vpack.c.bf16 %v608_v15, %v607_v35  ;;  %v547_v22 = vadd.f32 %v546_v1, %v2826_v41  ;;  %v650_v15 = vld [vmem:[%s3391_s3 + $0x108] sm:$0xff]  ;;  %v649_v35 = vld [vmem:[%s3391_s3 + $0x100] sm:$0xff] }
 0x10f   :  { %v610_v42 = vmax.f32 %v552_v39, 0.0  ;;  %v651_v39 = vld [vmem:[%s3391_s3 + $0x110] sm:$0xff]  ;;  %v654_v1 = vld [vmem:[%s3391_s3 + $0x128] sm:$0xff] }
 0x110   :  { %v609_v25 = vmax.f32 %v547_v22, 0.0  ;;  %v2073_v44 = vpop.f32.mrb[26].mxu0  ;;  %2115 = vmatpush1.bf16.msra.mxu1 %v2114_v40  ;;  %v653_v40 = vld [vmem:[%s3391_s3 + $0x120] sm:$0xff]  ;;  %v656_v22 = vld [vmem:[%s3391_s3 + $0x138] sm:$0xff] }
 0x111   :  { %v562_v19 = vadd.f32 %v2073_v44, %v238_v58  ;;  %v556_v45 = vpop.f32.mrb[27].mxu0  ;;  %2116 = vmatprep.subr.bf16.mxu1 %v2206_v21  ;;  %v657_v44 = vld [vmem:[%s3391_s3 + $0x140] sm:$0xff] }
 0x112   :  { %v2117_v9 = vpack.c.bf16 %v610_v42, %v609_v25  ;;  %v557_v46 = vadd.f32 %v556_v45, %v2841_v26  ;;  %v655_v42 = vld [vmem:[%s3391_s3 + $0x130] sm:$0xff]  ;;  %v658_v25 = vld [vmem:[%s3391_s3 + $0x148] sm:$0xff] }
 0x113   :  { %v612_v47 = vmax.f32 %v562_v19, 0.0  ;;  %v660_v19 = vld [vmem:[%s3391_s3 + $0x158] sm:$0xff]  ;;  %v659_v45 = vld [vmem:[%s3391_s3 + $0x150] sm:$0xff] }
 0x114   :  { %v611_v48 = vmax.f32 %v557_v46, 0.0  ;;  %v2076_v43 = vpop.f32.mrb[28].mxu0  ;;  %2118 = vmatpush1.bf16.msra.mxu1 %v2117_v9  ;;  %v662_v9 = vld [vmem:[%s3391_s3 + $0x168] sm:$0xff]  ;;  %v661_v46 = vld [vmem:[%s3391_s3 + $0x160] sm:$0xff] }
 0x115   :  { %v572_v50 = vadd.f32 %v2076_v43, %v248_v8  ;;  %v566_v51 = vpop.f32.mrb[29].mxu0  ;;  %2119 = vmatprep.subr.bf16.mxu1 %v2206_v21  ;;  %v627_v8 = vld [vmem:[%s3391_s3 + $0x50] sm:$0xff]  ;;  %v666_v43 = vld [vmem:[%s3391_s3 + $0x188] sm:$0xff] }
 0x116   :  { %v2120_v41 = vpack.c.bf16 %v612_v47, %v611_v48  ;;  %v567_v52 = vadd.f32 %v566_v51, %v243_v5  ;;  %v626_v5 = vld [vmem:[%s3391_s3 + $0x48] sm:$0xff]  ;;  %v664_v47 = vld [vmem:[%s3391_s3 + $0x178] sm:$0xff]  ;;  %v663_v48 = vld [vmem:[%s3391_s3 + $0x170] sm:$0xff] }
 0x117   :  { %v614_v27 = vmax.f32 %v572_v50, 0.0  ;;  %v665_v50 = vld [vmem:[%s3391_s3 + $0x180] sm:$0xff]  ;;  %v668_v51 = vld [vmem:[%s3391_s3 + $0x198] sm:$0xff] }
 0x118   :  { %v613_v55 = vmax.f32 %v567_v52, 0.0  ;;  %v2079_v56 = vpop.f32.mrb[30].mxu0  ;;  %2121 = vmatpush1.bf16.msra.mxu1 %v2120_v41  ;;  %v667_v41 = vld [vmem:[%s3391_s3 + $0x190] sm:$0xff]  ;;  %v670_v52 = vld [vmem:[%s3391_s3 + $0x1a8] sm:$0xff] }
 0x119   :  { %v582_v57 = vadd.f32 %v2079_v56, %v258_v54  ;;  %v576_v58 = vpop.f32.mrb[31].mxu0  ;;  %2122 = vmatprep.subr.bf16.mxu1 %v2206_v21  ;;  %v672_v54 = vld [vmem:[%s3391_s3 + $0x1b8] sm:$0xff]  ;;  %v674_v56 = vld [vmem:[%s3391_s3 + $0x1c8] sm:$0xff] }
 0x11a   :  { %v2123_v26 = vpack.c.bf16 %v614_v27, %v613_v55  ;;  %v577_v59 = vadd.f32 %v576_v58, %v253_v24  ;;  %v640_v24 = vld [vmem:[%s3391_s3 + $0xb8] sm:$0xff]  ;;  %v669_v27 = vld [vmem:[%s3391_s3 + $0x1a0] sm:$0xff]  ;;  %v671_v55 = vld [vmem:[%s3391_s3 + $0x1b0] sm:$0xff] }
 0x11b   :  { %v616_v32 = vmax.f32 %v582_v57, 0.0  ;;  %v673_v57 = vld [vmem:[%s3391_s3 + $0x1c0] sm:$0xff]  ;;  %v676_v58 = vld [vmem:[%s3391_s3 + $0x1d8] sm:$0xff] }
 0x11c   :  { %v615_v60 = vmax.f32 %v577_v59, 0.0  ;;  %2124 = vmatpush1.bf16.msra.mxu1 %v2123_v26  ;;  %v675_v26 = vld [vmem:[%s3391_s3 + $0x1d0] sm:$0xff]  ;;  %v678_v59 = vld [vmem:[%s3391_s3 + $0x1e8] sm:$0xff] }
 0x11d   :  { %2125 = vmatprep.subr.bf16.mxu1 %v2206_v21 }
 0x11e   :  { %v2126_v61 = vpack.c.bf16 %v616_v32, %v615_v60  ;;  %v677_v32 = vld [vmem:[%s3391_s3 + $0x1e0] sm:$0xff]  ;;  %v680_v60 = vld [vmem:[%s3391_s3 + $0x1f8] sm:$0xff] }
 0x120   :  { %2127 = vmatpush1.bf16.msra.mxu1 %v2126_v61  ;;  %v679_v61 = vld [vmem:[%s3391_s3 + $0x1f0] sm:$0xff] }
 0x123   :  { %938 = vmatmul.mubr.f32.vlgmr.msra.gmra.mrb[0].mxu1 %v617_v62 }
 0x124   :  { %942 = vmatprep.mubr.f32.mxu1 %v620_v63 }
 0x127   :  { %943 = vmatmul.mubr.f32.gmra.mrb[2].mxu1 %v619_v30  ;;  %v716_v30 = vpop.permute.xlu0 %715 }
 0x128   :  { %947 = vmatprep.mubr.f32.mxu1 %v622_v0 }
 0x12b   :  { %948 = vmatmul.mubr.f32.gmra.mrb[4].mxu1 %v621_v2  ;;  %v1131_v2 = vld [vmem:[%s3393_s5 + $0x8] sm:$0xff] }
 0x12c   :  { %952 = vmatprep.mubr.f32.mxu1 %v624_v3  ;;  %v721_v3 = vpop.permute.xlu1 %720  ;;  %1450 = vmatprep.mubr.f32.mxu0 %v1131_v2 }
 0x12f   :  { %953 = vmatmul.mubr.f32.gmra.mrb[6].mxu1 %v623_v6 }
 0x130   :  { %957 = vmatprep.mubr.f32.mxu1 %v626_v5 }
 0x133   :  { %958 = vmatmul.mubr.f32.gmra.mrb[8].mxu1 %v625_v7 }
 0x134   :  { %962 = vmatprep.mubr.f32.mxu1 %v628_v38 }
 0x137   :  { %963 = vmatmul.mubr.f32.gmra.mrb[10].mxu1 %v627_v8 }
 0x138   :  { %967 = vmatprep.mubr.f32.mxu1 %v630_v10 }
 0x13b   :  { %968 = vmatmul.mubr.f32.gmra.mrb[12].mxu1 %v629_v12 }
 0x13c   :  { %972 = vmatprep.mubr.f32.mxu1 %v632_v36 }
 0x13f   :  { %973 = vmatmul.mubr.f32.gmra.mrb[14].mxu1 %v631_v13  ;;  %v726_v13 = vpop.permute.xlu0 %725 }
 0x140   :  { %977 = vmatprep.mubr.f32.mxu1 %v634_v14 }
 0x143   :  { %978 = vmatmul.mubr.f32.gmra.mrb[16].mxu1 %v633_v17  ;;  %v731_v17 = vpop.permute.xlu1 %730 }
 0x144   :  { %982 = vmatprep.mubr.f32.mxu1 %v636_v11 }
 0x147   :  { %983 = vmatmul.mubr.f32.gmra.mrb[18].mxu1 %v635_v18 }
 0x148   :  { %987 = vmatprep.mubr.f32.mxu1 %v638_v20 }
 0x14b   :  { %988 = vmatmul.mubr.f32.gmra.mrb[20].mxu1 %v637_v23 }
 0x14c   :  { %992 = vmatprep.mubr.f32.mxu1 %v640_v24 }
 0x14f   :  { %993 = vmatmul.mubr.f32.gmra.mrb[22].mxu1 %v639_v53 }
 0x150   :  { %997 = vmatprep.mubr.f32.mxu1 %v642_v28 }
 0x153   :  { %998 = vmatmul.mubr.f32.gmra.mrb[24].mxu1 %v641_v16 }
 0x154   :  { %1002 = vmatprep.mubr.f32.mxu1 %v644_v29  ;;  %v736_v29 = vpop.permute.xlu0 %735 }
 0x157   :  { %1003 = vmatmul.mubr.f32.gmra.mrb[26].mxu1 %v643_v31 }
 0x158   :  { %1007 = vmatprep.mubr.f32.mxu1 %v646_v49  ;;  %v741_v49 = vpop.permute.xlu1 %740 }
 0x15b   :  { %1008 = vmatmul.mubr.f32.gmra.mrb[28].mxu1 %v645_v33 }
 0x15c   :  { %1012 = vmatprep.mubr.f32.mxu1 %v648_v34 }
 0x15f   :  { %1013 = vmatmul.mubr.f32.gmra.mrb[30].mxu1 %v647_v4 }
 0x160   :  { %1017 = vmatprep.mubr.f32.mxu1 %v650_v15 }
 0x163   :  { %1018 = vmatmul.mubr.f32.gmra.mrb[32].mxu1 %v649_v35 }
 0x164   :  { %1022 = vmatprep.mubr.f32.mxu1 %v652_v37 }
 0x167   :  { %1023 = vmatmul.mubr.f32.gmra.mrb[34].mxu1 %v651_v39 }
 0x168   :  { %1027 = vmatprep.mubr.f32.mxu1 %v654_v1 }
 0x16b   :  { %1028 = vmatmul.mubr.f32.gmra.mrb[36].mxu1 %v653_v40  ;;  %v746_v40 = vpop.permute.xlu0 %745 }
 0x16c   :  { %1032 = vmatprep.mubr.f32.mxu1 %v656_v22 }
 0x16f   :  { %1033 = vmatmul.mubr.f32.gmra.mrb[38].mxu1 %v655_v42  ;;  %v751_v42 = vpop.permute.xlu1 %750 }
 0x170   :  { %1037 = vmatprep.mubr.f32.mxu1 %v658_v25 }
 0x173   :  { %1038 = vmatmul.mubr.f32.gmra.mrb[40].mxu1 %v657_v44 }
 0x174   :  { %1042 = vmatprep.mubr.f32.mxu1 %v660_v19 }
 0x177   :  { %1043 = vmatmul.mubr.f32.gmra.mrb[42].mxu1 %v659_v45 }
 0x178   :  { %1047 = vmatprep.mubr.f32.mxu1 %v662_v9 }
 0x17b   :  { %1048 = vmatmul.mubr.f32.gmra.mrb[44].mxu1 %v661_v46 }
 0x17c   :  { %1052 = vmatprep.mubr.f32.mxu1 %v664_v47 }
 0x17f   :  { %1053 = vmatmul.mubr.f32.gmra.mrb[46].mxu1 %v663_v48 }
 0x180   :  { %1057 = vmatprep.mubr.f32.mxu1 %v666_v43  ;;  %v756_v43 = vpop.permute.xlu0 %755 }
 0x183   :  { %1058 = vmatmul.mubr.f32.gmra.mrb[48].mxu1 %v665_v50 }
 0x184   :  { %1062 = vmatprep.mubr.f32.mxu1 %v668_v51  ;;  %v761_v51 = vpop.permute.xlu1 %760 }
 0x187   :  { %1063 = vmatmul.mubr.f32.gmra.mrb[50].mxu1 %v667_v41 }
 0x188   :  { %1067 = vmatprep.mubr.f32.mxu1 %v670_v52 }
 0x18b   :  { %1068 = vmatmul.mubr.f32.gmra.mrb[52].mxu1 %v669_v27 }
 0x18c   :  { %1072 = vmatprep.mubr.f32.mxu1 %v672_v54 }
 0x18f   :  { %1073 = vmatmul.mubr.f32.gmra.mrb[54].mxu1 %v671_v55 }
 0x190   :  { %1077 = vmatprep.mubr.f32.mxu1 %v674_v56 }
 0x193   :  { %1078 = vmatmul.mubr.f32.gmra.mrb[56].mxu1 %v673_v57 }
 0x194   :  { %1082 = vmatprep.mubr.f32.mxu1 %v676_v58 }
 0x197   :  { %1083 = vmatmul.mubr.f32.gmra.mrb[58].mxu1 %v675_v26  ;;  %v766_v26 = vpop.permute.xlu0 %765 }
 0x198   :  { %1087 = vmatprep.mubr.f32.mxu1 %v678_v59 }
 0x19b   :  { %1088 = vmatmul.mubr.f32.gmra.mrb[60].mxu1 %v677_v32  ;;  %v771_v32 = vpop.permute.xlu1 %770 }
 0x19c   :  { %1092 = vmatprep.mubr.f32.mxu1 %v680_v60 }
 0x19f   :  { %1093 = vmatmul.mubr.f32.gmra.mrb[62].mxu1 %v679_v61 }
 0x1f6   :  { %v939_v62 = vpop.f32.mrb[0].mxu1 }
 0x1f7   :  { %v941_v63 = vpop.f32.mrb[1].mxu1  ;;  %v940_v0 = vadd.f32 %v939_v62, %v716_v30 }
 0x1f9   :  { %v1098_v38 = vmax.f32 %v940_v0, 0.0 }
 0x1fa   :  { %v944_v6 = vpop.f32.mrb[2].mxu1 }
 0x1fb   :  { %v945_v5 = vadd.f32 %v944_v6, %v721_v3  ;;  %v946_v7 = vpop.f32.mrb[3].mxu1  ;;  %v776_v6 = vpop.permute.xlu0 %775 }
 0x1fc   :  { %v781_v7 = vpop.permute.xlu1 %780 }
 0x1fd   :  { %v1099_v8 = vmax.f32 %v945_v5, 0.0 }
 0x1fe   :  { %v949_v10 = vpop.f32.mrb[4].mxu1 }
 0x1ff   :  { %v2129_v12 = vpack.c.bf16 %v1099_v8, %v1098_v38  ;;  %v951_v36 = vpop.f32.mrb[5].mxu1  ;;  %v950_v14 = vadd.f32 %v949_v10, %v726_v13 }
 0x201   :  { %2130 = vmatpush1.bf16.msra.mxu0 %v2129_v12  ;;  %v1100_v23 = vmax.f32 %v950_v14, 0.0 }
 0x202   :  { %v954_v11 = vpop.f32.mrb[6].mxu1  ;;  %2131 = vmatprep.subr.bf16.mxu0 %v2206_v21 }
 0x203   :  { %v955_v18 = vadd.f32 %v954_v11, %v731_v17  ;;  %v956_v20 = vpop.f32.mrb[7].mxu1  ;;  %v786_v11 = vpop.permute.xlu0 %785 }
 0x204   :  { %v791_v20 = vpop.permute.xlu1 %790 }
 0x205   :  { %v1101_v24 = vmax.f32 %v955_v18, 0.0 }
 0x206   :  { %v959_v53 = vpop.f32.mrb[8].mxu1 }
 0x207   :  { %v2132_v28 = vpack.c.bf16 %v1101_v24, %v1100_v23  ;;  %v961_v16 = vpop.f32.mrb[9].mxu1  ;;  %v960_v31 = vadd.f32 %v959_v53, %v736_v29 }
 0x209   :  { %2133 = vmatpush1.bf16.msra.mxu0 %v2132_v28  ;;  %v1102_v15 = vmax.f32 %v960_v31, 0.0 }
 0x20a   :  { %v964_v33 = vpop.f32.mrb[10].mxu1  ;;  %2134 = vmatprep.subr.bf16.mxu0 %v2206_v21 }
 0x20b   :  { %v965_v34 = vadd.f32 %v964_v33, %v741_v49  ;;  %v966_v4 = vpop.f32.mrb[11].mxu1  ;;  %v796_v33 = vpop.permute.xlu0 %795 }
 0x20c   :  { %v801_v4 = vpop.permute.xlu1 %800 }
 0x20d   :  { %v1103_v35 = vmax.f32 %v965_v34, 0.0 }
 0x20e   :  { %v969_v37 = vpop.f32.mrb[12].mxu1 }
 0x20f   :  { %v2135_v39 = vpack.c.bf16 %v1103_v35, %v1102_v15  ;;  %v971_v1 = vpop.f32.mrb[13].mxu1  ;;  %v970_v22 = vadd.f32 %v969_v37, %v746_v40 }
 0x211   :  { %2136 = vmatpush1.bf16.msra.mxu0 %v2135_v39  ;;  %v1104_v45 = vmax.f32 %v970_v22, 0.0 }
 0x212   :  { %v974_v25 = vpop.f32.mrb[14].mxu1  ;;  %2137 = vmatprep.subr.bf16.mxu0 %v2206_v21 }
 0x213   :  { %v975_v44 = vadd.f32 %v974_v25, %v751_v42  ;;  %v976_v19 = vpop.f32.mrb[15].mxu1  ;;  %v806_v25 = vpop.permute.xlu0 %805 }
 0x214   :  { %v811_v19 = vpop.permute.xlu1 %810 }
 0x215   :  { %v1105_v9 = vmax.f32 %v975_v44, 0.0 }
 0x216   :  { %v979_v46 = vpop.f32.mrb[16].mxu1 }
 0x217   :  { %v2138_v47 = vpack.c.bf16 %v1105_v9, %v1104_v45  ;;  %v981_v48 = vpop.f32.mrb[17].mxu1  ;;  %v980_v50 = vadd.f32 %v979_v46, %v756_v43 }
 0x219   :  { %2139 = vmatpush1.bf16.msra.mxu0 %v2138_v47  ;;  %v1106_v54 = vmax.f32 %v980_v50, 0.0 }
 0x21a   :  { %v984_v41 = vpop.f32.mrb[18].mxu1  ;;  %2140 = vmatprep.subr.bf16.mxu0 %v2206_v21 }
 0x21b   :  { %v985_v52 = vadd.f32 %v984_v41, %v761_v51  ;;  %v986_v27 = vpop.f32.mrb[19].mxu1  ;;  %v816_v41 = vpop.permute.xlu0 %815 }
 0x21c   :  { %v821_v27 = vpop.permute.xlu1 %820 }
 0x21d   :  { %v1107_v55 = vmax.f32 %v985_v52, 0.0 }
 0x21e   :  { %v989_v56 = vpop.f32.mrb[20].mxu1 }
 0x21f   :  { %v2141_v57 = vpack.c.bf16 %v1107_v55, %v1106_v54  ;;  %v991_v58 = vpop.f32.mrb[21].mxu1  ;;  %v990_v59 = vadd.f32 %v989_v56, %v766_v26 }
 0x221   :  { %2142 = vmatpush1.bf16.msra.mxu0 %v2141_v57  ;;  %v1108_v63 = vmax.f32 %v990_v59, 0.0 }
 0x222   :  { %v994_v60 = vpop.f32.mrb[22].mxu1  ;;  %2143 = vmatprep.subr.bf16.mxu0 %v2206_v21 }
 0x223   :  { %v995_v61 = vadd.f32 %v994_v60, %v771_v32  ;;  %v996_v62 = vpop.f32.mrb[23].mxu1  ;;  %v826_v60 = vpop.permute.xlu0 %825 }
 0x224   :  { %v831_v62 = vpop.permute.xlu1 %830 }
 0x225   :  { %v1109_v30 = vmax.f32 %v995_v61, 0.0 }
 0x226   :  { %v999_v0 = vpop.f32.mrb[24].mxu1 }
 0x227   :  { %v2144_v2 = vpack.c.bf16 %v1109_v30, %v1108_v63  ;;  %v1001_v3 = vpop.f32.mrb[25].mxu1  ;;  %v1000_v5 = vadd.f32 %v999_v0, %v776_v6 }
 0x229   :  { %2145 = vmatpush1.bf16.msra.mxu0 %v2144_v2  ;;  %v1110_v12 = vmax.f32 %v1000_v5, 0.0 }
 0x22a   :  { %v1004_v38 = vpop.f32.mrb[26].mxu1  ;;  %2146 = vmatprep.subr.bf16.mxu0 %v2206_v21 }
 0x22b   :  { %v1005_v8 = vadd.f32 %v1004_v38, %v781_v7  ;;  %v1006_v10 = vpop.f32.mrb[27].mxu1  ;;  %v836_v38 = vpop.permute.xlu0 %835 }
 0x22c   :  { %v841_v10 = vpop.permute.xlu1 %840 }
 0x22d   :  { %v1111_v36 = vmax.f32 %v1005_v8, 0.0 }
 0x22e   :  { %v1009_v13 = vpop.f32.mrb[28].mxu1 }
 0x22f   :  { %v2147_v14 = vpack.c.bf16 %v1111_v36, %v1110_v12  ;;  %v1011_v17 = vpop.f32.mrb[29].mxu1  ;;  %v1010_v18 = vadd.f32 %v1009_v13, %v786_v11 }
 0x231   :  { %2148 = vmatpush1.bf16.msra.mxu0 %v2147_v14  ;;  %v1112_v28 = vmax.f32 %v1010_v18, 0.0 }
 0x232   :  { %v1014_v23 = vpop.f32.mrb[30].mxu1  ;;  %2149 = vmatprep.subr.bf16.mxu0 %v2206_v21 }
 0x233   :  { %v1015_v24 = vadd.f32 %v1014_v23, %v791_v20  ;;  %v1016_v53 = vpop.f32.mrb[31].mxu1  ;;  %v846_v23 = vpop.permute.xlu0 %845 }
 0x234   :  { %v851_v53 = vpop.permute.xlu1 %850 }
 0x235   :  { %v1113_v16 = vmax.f32 %v1015_v24, 0.0 }
 0x236   :  { %v1019_v29 = vpop.f32.mrb[32].mxu1 }
 0x237   :  { %v2150_v31 = vpack.c.bf16 %v1113_v16, %v1112_v28  ;;  %v1021_v49 = vpop.f32.mrb[33].mxu1  ;;  %v1020_v34 = vadd.f32 %v1019_v29, %v796_v33 }
 0x239   :  { %2151 = vmatpush1.bf16.msra.mxu0 %v2150_v31  ;;  %v1114_v39 = vmax.f32 %v1020_v34, 0.0 }
 0x23a   :  { %v1024_v15 = vpop.f32.mrb[34].mxu1  ;;  %2152 = vmatprep.subr.bf16.mxu0 %v2206_v21 }
 0x23b   :  { %v1025_v35 = vadd.f32 %v1024_v15, %v801_v4  ;;  %v1026_v37 = vpop.f32.mrb[35].mxu1  ;;  %v856_v15 = vpop.permute.xlu0 %855 }
 0x23c   :  { %v861_v37 = vpop.permute.xlu1 %860 }
 0x23d   :  { %v1115_v1 = vmax.f32 %v1025_v35, 0.0 }
 0x23e   :  { %v1029_v40 = vpop.f32.mrb[36].mxu1 }
 0x23f   :  { %v2153_v22 = vpack.c.bf16 %v1115_v1, %v1114_v39  ;;  %v1031_v42 = vpop.f32.mrb[37].mxu1  ;;  %v1030_v44 = vadd.f32 %v1029_v40, %v806_v25 }
 0x241   :  { %2154 = vmatpush1.bf16.msra.mxu0 %v2153_v22  ;;  %v1116_v47 = vmax.f32 %v1030_v44, 0.0 }
 0x242   :  { %v1034_v45 = vpop.f32.mrb[38].mxu1  ;;  %2155 = vmatprep.subr.bf16.mxu0 %v2206_v21 }
 0x243   :  { %v1035_v9 = vadd.f32 %v1034_v45, %v811_v19  ;;  %v1036_v46 = vpop.f32.mrb[39].mxu1  ;;  %v866_v45 = vpop.permute.xlu0 %865 }
 0x244   :  { %v871_v46 = vpop.permute.xlu1 %870 }
 0x245   :  { %v1117_v48 = vmax.f32 %v1035_v9, 0.0 }
 0x246   :  { %v1039_v43 = vpop.f32.mrb[40].mxu1 }
 0x247   :  { %v2156_v50 = vpack.c.bf16 %v1117_v48, %v1116_v47  ;;  %v1041_v51 = vpop.f32.mrb[41].mxu1  ;;  %v1040_v52 = vadd.f32 %v1039_v43, %v816_v41 }
 0x249   :  { %2157 = vmatpush1.bf16.msra.mxu0 %v2156_v50  ;;  %v1118_v57 = vmax.f32 %v1040_v52, 0.0  ;;  %v1130_v52 = vld [vmem:[%s3393_s5] sm:$0xff] }
 0x24a   :  { %v1044_v54 = vpop.f32.mrb[42].mxu1  ;;  %2158 = vmatprep.subr.bf16.mxu0 %v2206_v21 }
 0x24b   :  { %v1045_v55 = vadd.f32 %v1044_v54, %v821_v27  ;;  %v1046_v56 = vpop.f32.mrb[43].mxu1  ;;  %v1133_v27 = vld [vmem:[%s3393_s5 + $0x18] sm:$0xff]  ;;  %v1135_v54 = vld [vmem:[%s3393_s5 + $0x28] sm:$0xff] }
 0x24c   :  { %v1137_v56 = vld [vmem:[%s3393_s5 + $0x38] sm:$0xff] }
 0x24d   :  { %v1119_v58 = vmax.f32 %v1045_v55, 0.0  ;;  %v1134_v55 = vld [vmem:[%s3393_s5 + $0x20] sm:$0xff] }
 0x24e   :  { %v1049_v26 = vpop.f32.mrb[44].mxu1 }
 0x24f   :  { %v2159_v59 = vpack.c.bf16 %v1119_v58, %v1118_v57  ;;  %v1051_v32 = vpop.f32.mrb[45].mxu1  ;;  %v1050_v61 = vadd.f32 %v1049_v26, %v826_v60  ;;  %v1136_v57 = vld [vmem:[%s3393_s5 + $0x30] sm:$0xff]  ;;  %v1139_v58 = vld [vmem:[%s3393_s5 + $0x48] sm:$0xff]  ;;  %v1138_v26 = vld [vmem:[%s3393_s5 + $0x40] sm:$0xff] }
 0x250   :  { %v1140_v32 = vld [vmem:[%s3393_s5 + $0x50] sm:$0xff]  ;;  %v1143_v60 = vld [vmem:[%s3393_s5 + $0x68] sm:$0xff] }
 0x251   :  { %2160 = vmatpush1.bf16.msra.mxu0 %v2159_v59  ;;  %v1120_v2 = vmax.f32 %v1050_v61, 0.0  ;;  %v1141_v59 = vld [vmem:[%s3393_s5 + $0x58] sm:$0xff]  ;;  %v1142_v61 = vld [vmem:[%s3393_s5 + $0x60] sm:$0xff] }
 0x252   :  { %v1054_v63 = vpop.f32.mrb[46].mxu1  ;;  %2161 = vmatprep.subr.bf16.mxu0 %v2206_v21 }
 0x253   :  { %v1055_v30 = vadd.f32 %v1054_v63, %v831_v62  ;;  %v1056_v0 = vpop.f32.mrb[47].mxu1  ;;  %v1145_v62 = vld [vmem:[%s3393_s5 + $0x78] sm:$0xff]  ;;  %v1144_v63 = vld [vmem:[%s3393_s5 + $0x70] sm:$0xff] }
 0x254   :  { %v1146_v0 = vld [vmem:[%s3393_s5 + $0x80] sm:$0xff] }
 0x255   :  { %v1121_v3 = vmax.f32 %v1055_v30, 0.0  ;;  %v1147_v30 = vld [vmem:[%s3393_s5 + $0x88] sm:$0xff] }
 0x256   :  { %v1059_v6 = vpop.f32.mrb[48].mxu1 }
 0x257   :  { %v2162_v5 = vpack.c.bf16 %v1121_v3, %v1120_v2  ;;  %v1061_v7 = vpop.f32.mrb[49].mxu1  ;;  %v1060_v8 = vadd.f32 %v1059_v6, %v836_v38  ;;  %v1149_v2 = vld [vmem:[%s3393_s5 + $0x98] sm:$0xff]  ;;  %v1148_v3 = vld [vmem:[%s3393_s5 + $0x90] sm:$0xff]  ;;  %v1151_v6 = vld [vmem:[%s3393_s5 + $0xa8] sm:$0xff] }
 0x258   :  { %v1153_v7 = vld [vmem:[%s3393_s5 + $0xb8] sm:$0xff]  ;;  %v1152_v38 = vld [vmem:[%s3393_s5 + $0xb0] sm:$0xff] }
 0x259   :  { %2163 = vmatpush1.bf16.msra.mxu0 %v2162_v5  ;;  %v1122_v14 = vmax.f32 %v1060_v8, 0.0  ;;  %v1150_v5 = vld [vmem:[%s3393_s5 + $0xa0] sm:$0xff]  ;;  %v1155_v8 = vld [vmem:[%s3393_s5 + $0xc8] sm:$0xff] }
 0x25a   :  { %v1064_v12 = vpop.f32.mrb[50].mxu1  ;;  %2164 = vmatprep.subr.bf16.mxu0 %v2206_v21 }
 0x25b   :  { %v1065_v36 = vadd.f32 %v1064_v12, %v841_v10  ;;  %v1066_v13 = vpop.f32.mrb[51].mxu1  ;;  %v1154_v10 = vld [vmem:[%s3393_s5 + $0xc0] sm:$0xff]  ;;  %v1157_v12 = vld [vmem:[%s3393_s5 + $0xd8] sm:$0xff] }
 0x25c   :  { %v1159_v13 = vld [vmem:[%s3393_s5 + $0xe8] sm:$0xff] }
 0x25d   :  { %v1123_v17 = vmax.f32 %v1065_v36, 0.0  ;;  %v1156_v36 = vld [vmem:[%s3393_s5 + $0xd0] sm:$0xff] }
 0x25e   :  { %v1069_v11 = vpop.f32.mrb[52].mxu1 }
 0x25f   :  { %v2165_v18 = vpack.c.bf16 %v1123_v17, %v1122_v14  ;;  %v1071_v20 = vpop.f32.mrb[53].mxu1  ;;  %v1070_v24 = vadd.f32 %v1069_v11, %v846_v23  ;;  %v1158_v14 = vld [vmem:[%s3393_s5 + $0xe0] sm:$0xff]  ;;  %v1161_v17 = vld [vmem:[%s3393_s5 + $0xf8] sm:$0xff]  ;;  %v1160_v11 = vld [vmem:[%s3393_s5 + $0xf0] sm:$0xff] }
 0x260   :  { %v1162_v20 = vld [vmem:[%s3393_s5 + $0x100] sm:$0xff]  ;;  %v1165_v23 = vld [vmem:[%s3393_s5 + $0x118] sm:$0xff] }
 0x261   :  { %2166 = vmatpush1.bf16.msra.mxu0 %v2165_v18  ;;  %v1124_v31 = vmax.f32 %v1070_v24, 0.0  ;;  %v1163_v18 = vld [vmem:[%s3393_s5 + $0x108] sm:$0xff]  ;;  %v1164_v24 = vld [vmem:[%s3393_s5 + $0x110] sm:$0xff] }
 0x262   :  { %v1074_v28 = vpop.f32.mrb[54].mxu1  ;;  %2167 = vmatprep.subr.bf16.mxu0 %v2206_v21 }
 0x263   :  { %v1075_v16 = vadd.f32 %v1074_v28, %v851_v53  ;;  %v1076_v29 = vpop.f32.mrb[55].mxu1  ;;  %v1167_v53 = vld [vmem:[%s3393_s5 + $0x128] sm:$0xff]  ;;  %v1166_v28 = vld [vmem:[%s3393_s5 + $0x120] sm:$0xff] }
 0x264   :  { %v1168_v29 = vld [vmem:[%s3393_s5 + $0x130] sm:$0xff] }
 0x265   :  { %v1125_v49 = vmax.f32 %v1075_v16, 0.0  ;;  %v1169_v16 = vld [vmem:[%s3393_s5 + $0x138] sm:$0xff] }
 0x266   :  { %v1079_v33 = vpop.f32.mrb[56].mxu1 }
 0x267   :  { %v2168_v34 = vpack.c.bf16 %v1125_v49, %v1124_v31  ;;  %v1081_v4 = vpop.f32.mrb[57].mxu1  ;;  %v1080_v35 = vadd.f32 %v1079_v33, %v856_v15  ;;  %v1171_v31 = vld [vmem:[%s3393_s5 + $0x148] sm:$0xff]  ;;  %v1170_v49 = vld [vmem:[%s3393_s5 + $0x140] sm:$0xff]  ;;  %v1173_v33 = vld [vmem:[%s3393_s5 + $0x158] sm:$0xff] }
 0x268   :  { %v1175_v4 = vld [vmem:[%s3393_s5 + $0x168] sm:$0xff]  ;;  %v1174_v15 = vld [vmem:[%s3393_s5 + $0x160] sm:$0xff] }
 0x269   :  { %2169 = vmatpush1.bf16.msra.mxu0 %v2168_v34  ;;  %v1126_v22 = vmax.f32 %v1080_v35, 0.0  ;;  %v1172_v34 = vld [vmem:[%s3393_s5 + $0x150] sm:$0xff]  ;;  %v1177_v35 = vld [vmem:[%s3393_s5 + $0x178] sm:$0xff] }
 0x26a   :  { %v1084_v39 = vpop.f32.mrb[58].mxu1  ;;  %2170 = vmatprep.subr.bf16.mxu0 %v2206_v21 }
 0x26b   :  { %v1085_v1 = vadd.f32 %v1084_v39, %v861_v37  ;;  %v1086_v40 = vpop.f32.mrb[59].mxu1  ;;  %v1176_v37 = vld [vmem:[%s3393_s5 + $0x170] sm:$0xff]  ;;  %v1179_v39 = vld [vmem:[%s3393_s5 + $0x188] sm:$0xff] }
 0x26c   :  { %v1181_v40 = vld [vmem:[%s3393_s5 + $0x198] sm:$0xff] }
 0x26d   :  { %v1127_v42 = vmax.f32 %v1085_v1, 0.0  ;;  %v1178_v1 = vld [vmem:[%s3393_s5 + $0x180] sm:$0xff] }
 0x26e   :  { %v1089_v25 = vpop.f32.mrb[60].mxu1 }
 0x26f   :  { %v2171_v44 = vpack.c.bf16 %v1127_v42, %v1126_v22  ;;  %v1091_v19 = vpop.f32.mrb[61].mxu1  ;;  %v1090_v9 = vadd.f32 %v1089_v25, %v866_v45  ;;  %v1180_v22 = vld [vmem:[%s3393_s5 + $0x190] sm:$0xff]  ;;  %v1183_v42 = vld [vmem:[%s3393_s5 + $0x1a8] sm:$0xff]  ;;  %v1182_v25 = vld [vmem:[%s3393_s5 + $0x1a0] sm:$0xff] }
 0x270   :  { %v1184_v19 = vld [vmem:[%s3393_s5 + $0x1b0] sm:$0xff]  ;;  %v1187_v45 = vld [vmem:[%s3393_s5 + $0x1c8] sm:$0xff] }
 0x271   :  { %2172 = vmatpush1.bf16.msra.mxu0 %v2171_v44  ;;  %v1128_v50 = vmax.f32 %v1090_v9, 0.0  ;;  %v1185_v44 = vld [vmem:[%s3393_s5 + $0x1b8] sm:$0xff]  ;;  %v1186_v9 = vld [vmem:[%s3393_s5 + $0x1c0] sm:$0xff] }
 0x272   :  { %v1094_v47 = vpop.f32.mrb[62].mxu1  ;;  %2173 = vmatprep.subr.bf16.mxu0 %v2206_v21  ;;  %v1132_v21 = vld [vmem:[%s3393_s5 + $0x10] sm:$0xff] }
 0x273   :  { %v1095_v48 = vadd.f32 %v1094_v47, %v871_v46  ;;  %v1096_v43 = vpop.f32.mrb[63].mxu1  ;;  %v1189_v46 = vld [vmem:[%s3393_s5 + $0x1d8] sm:$0xff]  ;;  %v1188_v47 = vld [vmem:[%s3393_s5 + $0x1d0] sm:$0xff] }
 0x274   :  { %v1190_v43 = vld [vmem:[%s3393_s5 + $0x1e0] sm:$0xff] }
 0x275   :  { %v1129_v51 = vmax.f32 %v1095_v48, 0.0  ;;  %v1191_v48 = vld [vmem:[%s3393_s5 + $0x1e8] sm:$0xff] }
 0x277   :  { %v2174_v41 = vpack.c.bf16 %v1129_v51, %v1128_v50  ;;  %v1193_v50 = vld [vmem:[%s3393_s5 + $0x1f8] sm:$0xff]  ;;  %v1192_v51 = vld [vmem:[%s3393_s5 + $0x1f0] sm:$0xff]  ;;  %s2207_s5 = smov [#allocation3]  }
 0x278   :  { %s1956_s12 = sshll.u32 %s2207_s5, 4  ;;  %s1957_s12 = int_to_ptr.vmem [resolvable:$true] %s1956_s12 }
 0x279   :  { %2175 = vmatpush1.bf16.msra.mxu0 %v2174_v41  ;;  %v1229_v41 = vpop.permute.xlu0 %1228  ;;  %s2181_s13 = scalar_lea.vmem %s1957_s12, 16  ;;  %s2185_s6 = scalar_lea.vmem %s1957_s12, 32 }
 0x27a   :  { %p2182_p0 = scmp.ne.s32.totalorder %s1957_s12, %s2181_s13  ;;  %p2186_p1 = scmp.lt.s32.totalorder %s1957_s12, %s1957_s12 }
 0x27b   :  { %p2187_p2 = scmp.lt.s32.totalorder %s2185_s6, %s2181_s13 }
 0x27c   :  { %1451 = vmatmul.mubr.f32.vlgmr.msra.gmra.mrb[32].mxu0 %v1130_v52  ;;  %v1234_v52 = vpop.permute.xlu1 %1233 }
 0x27d   :  { %1455 = vmatprep.mubr.f32.mxu0 %v1133_v27  ;;  %v1239_v27 = vpop.permute.xlu0 %1238  ;;  %p2188_p3 = por %p2187_p2, %p2186_p1 }
 0x27f   :  { %p2189_p4 = pnand %p2188_p3, %p2182_p0 }
 0x280   :  { %1456 = vmatmul.mubr.f32.gmra.mrb[34].mxu0 %v1132_v21  ;;  %v1244_v21 = vpop.permute.xlu1 %1243 }
 0x281   :  { %1460 = vmatprep.mubr.f32.mxu0 %v1135_v54  ;;  %v1249_v54 = vpop.permute.xlu0 %1248 }
 0x284   :  { %1461 = vmatmul.mubr.f32.gmra.mrb[36].mxu0 %v1134_v55  ;;  %v3272_v55 = vpop.permute.xlu1 %1253 }
 0x285   :  { %1465 = vmatprep.mubr.f32.mxu0 %v1137_v56  ;;  %v3274_v56 = vpop.permute.xlu0 %1258 }
 0x288   :  { %1466 = vmatmul.mubr.f32.gmra.mrb[38].mxu0 %v1136_v57  ;;  %v3276_v57 = vpop.permute.xlu1 %1263 }
 0x289   :  { %1470 = vmatprep.mubr.f32.mxu0 %v1139_v58  ;;  %v3278_v58 = vpop.permute.xlu0 %1268 }
 0x28c   :  { %1471 = vmatmul.mubr.f32.gmra.mrb[40].mxu0 %v1138_v26  ;;  %v3280_v26 = vpop.permute.xlu1 %1273 }
 0x28d   :  { %1475 = vmatprep.mubr.f32.mxu0 %v1141_v59  ;;  %v3282_v59 = vpop.permute.xlu0 %1278 }
 0x290   :  { %1476 = vmatmul.mubr.f32.gmra.mrb[42].mxu0 %v1140_v32  ;;  %v3284_v32 = vpop.permute.xlu1 %1283 }
 0x291   :  { %1480 = vmatprep.mubr.f32.mxu0 %v1143_v60  ;;  %v3286_v60 = vpop.permute.xlu0 %1288 }
 0x294   :  { %1481 = vmatmul.mubr.f32.gmra.mrb[44].mxu0 %v1142_v61  ;;  %v3288_v61 = vpop.permute.xlu1 %1293 }
 0x295   :  { %1485 = vmatprep.mubr.f32.mxu0 %v1145_v62  ;;  %v3290_v62 = vpop.permute.xlu0 %1298 }
 0x298   :  { %1486 = vmatmul.mubr.f32.gmra.mrb[46].mxu0 %v1144_v63  ;;  %v3292_v63 = vpop.permute.xlu1 %1303 }
 0x299   :  { %1490 = vmatprep.mubr.f32.mxu0 %v1147_v30  ;;  %v3294_v30 = vpop.permute.xlu0 %1308 }
 0x29c   :  { %1491 = vmatmul.mubr.f32.gmra.mrb[48].mxu0 %v1146_v0  ;;  %v3296_v0 = vpop.permute.xlu1 %1313 }
 0x29d   :  { %1495 = vmatprep.mubr.f32.mxu0 %v1149_v2  ;;  %v3298_v2 = vpop.permute.xlu0 %1318 }
 0x2a0   :  { %1496 = vmatmul.mubr.f32.gmra.mrb[50].mxu0 %v1148_v3  ;;  %v3300_v3 = vpop.permute.xlu1 %1323 }
 0x2a1   :  { %1500 = vmatprep.mubr.f32.mxu0 %v1151_v6  ;;  %v3302_v6 = vpop.permute.xlu0 %1328 }
 0x2a4   :  { %1501 = vmatmul.mubr.f32.gmra.mrb[52].mxu0 %v1150_v5  ;;  %v3304_v5 = vpop.permute.xlu1 %1333 }
 0x2a5   :  { %1505 = vmatprep.mubr.f32.mxu0 %v1153_v7  ;;  %v3306_v7 = vpop.permute.xlu0 %1338 }
 0x2a8   :  { %1506 = vmatmul.mubr.f32.gmra.mrb[54].mxu0 %v1152_v38  ;;  %v3308_v38 = vpop.permute.xlu1 %1343 }
 0x2a9   :  { %1510 = vmatprep.mubr.f32.mxu0 %v1155_v8  ;;  %v3310_v8 = vpop.permute.xlu0 %1348 }
 0x2ac   :  { %1511 = vmatmul.mubr.f32.gmra.mrb[56].mxu0 %v1154_v10  ;;  %v3312_v10 = vpop.permute.xlu1 %1353 }
 0x2ad   :  { %1515 = vmatprep.mubr.f32.mxu0 %v1157_v12  ;;  %v3314_v12 = vpop.permute.xlu0 %1358 }
 0x2b0   :  { %1516 = vmatmul.mubr.f32.gmra.mrb[58].mxu0 %v1156_v36  ;;  %v3316_v36 = vpop.permute.xlu1 %1363 }
 0x2b1   :  { %1520 = vmatprep.mubr.f32.mxu0 %v1159_v13 }
 0x2b4   :  { %1521 = vmatmul.mubr.f32.gmra.mrb[60].mxu0 %v1158_v14 }
 0x2b5   :  { %1525 = vmatprep.mubr.f32.mxu0 %v1161_v17 }
 0x2b8   :  { %1526 = vmatmul.mubr.f32.gmra.mrb[62].mxu0 %v1160_v11  ;;  %v3318_v11 = vpop.permute.xlu0 %1368 }
 0x2b9   :  { %1530 = vmatprep.mubr.f32.mxu0 %v1163_v18 }
 0x2bc   :  { %1531 = vmatmul.mubr.f32.gmra.mrb[64].mxu0 %v1162_v20 }
 0x2bd   :  { %1535 = vmatprep.mubr.f32.mxu0 %v1165_v23 }
 0x2c0   :  { %1536 = vmatmul.mubr.f32.gmra.mrb[66].mxu0 %v1164_v24 }
 0x2c1   :  { %1540 = vmatprep.mubr.f32.mxu0 %v1167_v53  ;;  %v1678_v53 = vpop.permute.xlu1 %1677 }
 0x2c4   :  { %1541 = vmatmul.mubr.f32.gmra.mrb[68].mxu0 %v1166_v28 }
 0x2c5   :  { %1545 = vmatprep.mubr.f32.mxu0 %v1169_v16 }
 0x2c8   :  { %1546 = vmatmul.mubr.f32.gmra.mrb[70].mxu0 %v1168_v29  ;;  %v1683_v29 = vpop.permute.xlu0 %1682 }
 0x2c9   :  { %1550 = vmatprep.mubr.f32.mxu0 %v1171_v31 }
 0x2cc   :  { %1551 = vmatmul.mubr.f32.gmra.mrb[72].mxu0 %v1170_v49 }
 0x2cd   :  { %1555 = vmatprep.mubr.f32.mxu0 %v1173_v33 }
 0x2d0   :  { %1556 = vmatmul.mubr.f32.gmra.mrb[74].mxu0 %v1172_v34 }
 0x2d1   :  { %1560 = vmatprep.mubr.f32.mxu0 %v1175_v4 }
 0x2d4   :  { %1561 = vmatmul.mubr.f32.gmra.mrb[76].mxu0 %v1174_v15 }
 0x2d5   :  { %1565 = vmatprep.mubr.f32.mxu0 %v1177_v35 }
 0x2d8   :  { %1566 = vmatmul.mubr.f32.gmra.mrb[78].mxu0 %v1176_v37  ;;  %v1688_v37 = vpop.permute.xlu1 %1687 }
 0x2d9   :  { %1570 = vmatprep.mubr.f32.mxu0 %v1179_v39 }
 0x2dc   :  { %1571 = vmatmul.mubr.f32.gmra.mrb[80].mxu0 %v1178_v1 }
 0x2dd   :  { %1575 = vmatprep.mubr.f32.mxu0 %v1181_v40 }
 0x2e0   :  { %1576 = vmatmul.mubr.f32.gmra.mrb[82].mxu0 %v1180_v22 }
 0x2e1   :  { %1580 = vmatprep.mubr.f32.mxu0 %v1183_v42 }
 0x2e4   :  { %1581 = vmatmul.mubr.f32.gmra.mrb[84].mxu0 %v1182_v25 }
 0x2e5   :  { %1585 = vmatprep.mubr.f32.mxu0 %v1185_v44 }
 0x2e8   :  { %1586 = vmatmul.mubr.f32.gmra.mrb[86].mxu0 %v1184_v19  ;;  %v1693_v19 = vpop.permute.xlu0 %1692 }
 0x2e9   :  { %1590 = vmatprep.mubr.f32.mxu0 %v1187_v45 }
 0x2ec   :  { %1591 = vmatmul.mubr.f32.gmra.mrb[88].mxu0 %v1186_v9 }
 0x2ed   :  { %1595 = vmatprep.mubr.f32.mxu0 %v1189_v46 }
 0x2f0   :  { %1596 = vmatmul.mubr.f32.gmra.mrb[90].mxu0 %v1188_v47 }
 0x2f1   :  { %1600 = vmatprep.mubr.f32.mxu0 %v1191_v48 }
 0x2f4   :  { %1601 = vmatmul.mubr.f32.gmra.mrb[92].mxu0 %v1190_v43 }
 0x2f5   :  { %1605 = vmatprep.mubr.f32.mxu0 %v1193_v50 }
 0x2f8   :  { %1606 = vmatmul.mubr.f32.gmra.mrb[94].mxu0 %v1192_v51  ;;  %v1698_v51 = vpop.permute.xlu1 %1697 }
 0x34f   :  { %v1452_v13 = vpop.f32.mrb[32].mxu0 }
 0x350   :  { %v1453_v14 = vadd.f32 %v1452_v13, %v1229_v41  ;;  %v1454_v17 = vpop.f32.mrb[33].mxu0 }
 0x352   :  { %v1611_v18 = vmax.f32 %v1453_v14, 0.0 }
 0x353   :  { %v1457_v20 = vpop.f32.mrb[34].mxu0 }
 0x354   :  { %v1458_v23 = vadd.f32 %v1457_v20, %v1234_v52  ;;  %v1459_v24 = vpop.f32.mrb[35].mxu0  ;;  %v1835_v28 = vmul.f32 %v1678_v53, %v1611_v18  ;;  %v1703_v18 = vpop.permute.xlu0 %1702 }
 0x356   :  { %v1612_v16 = vmax.f32 %v1458_v23, 0.0  ;;  %v1868_v4 = vsel %vm1867_vm1, %v1835_v28, 0.0 }
 0x357   :  { %v1462_v31 = vpop.f32.mrb[36].mxu0 }
 0x358   :  { %v1836_v49 = vmul.f32 %v1683_v29, %v1612_v16  ;;  %v1463_v33 = vadd.f32 %v1462_v31, %v1239_v27  ;;  %v1464_v34 = vpop.f32.mrb[37].mxu0  ;;  %v1708_v29 = vpop.permute.xlu1 %1707 }
 0x35a   :  { %v1869_v15 = vsel %vm1867_vm1, %v1836_v49, 0.0  ;;  %v1613_v35 = vmax.f32 %v1463_v33, 0.0 }
 0x35b   :  { %v1870_v39 = vadd.f32 %v1869_v15, %v1868_v4  ;;  %v1467_v1 = vpop.f32.mrb[38].mxu0 }
 0x35c   :  { %v1837_v40 = vmul.f32 %v1688_v37, %v1613_v35  ;;  %v1468_v22 = vadd.f32 %v1467_v1, %v1244_v21  ;;  %v1469_v42 = vpop.f32.mrb[39].mxu0  ;;  %v1713_v35 = vpop.permute.xlu0 %1712 }
 0x35e   :  { %v1871_v25 = vsel %vm1867_vm1, %v1837_v40, 0.0  ;;  %v1614_v44 = vmax.f32 %v1468_v22, 0.0 }
 0x35f   :  { %v1872_v45 = vadd.f32 %v1871_v25, %v1870_v39  ;;  %v1472_v9 = vpop.f32.mrb[40].mxu0  ;;  %v1718_v25 = vpop.permute.xlu1 %1717 }
 0x360   :  { %v1838_v46 = vmul.f32 %v1693_v19, %v1614_v44  ;;  %v1473_v47 = vadd.f32 %v1472_v9, %v1249_v54  ;;  %v1474_v48 = vpop.f32.mrb[41].mxu0 }
 0x361   :  { %v1723_v48 = vpop.permute.xlu0 %1722 }
 0x362   :  { %v1873_v43 = vsel %vm1867_vm1, %v1838_v46, 0.0  ;;  %v1615_v50 = vmax.f32 %v1473_v47, 0.0 }
 0x363   :  { %v1874_v41 = vadd.f32 %v1873_v43, %v1872_v45  ;;  %v1477_v52 = vpop.f32.mrb[42].mxu0 }
 0x364   :  { %v1839_v27 = vmul.f32 %v1698_v51, %v1615_v50  ;;  %v1478_v13 = vadd.f32 %v1477_v52, %v3272_v55  ;;  %v1479_v21 = vpop.f32.mrb[43].mxu0 }
 0x366   :  { %v1875_v14 = vsel %vm1867_vm1, %v1839_v27, 0.0  ;;  %v1616_v17 = vmax.f32 %v1478_v13, 0.0  ;;  %v1728_v13 = vpop.permute.xlu1 %1727 }
 0x367   :  { %v1876_v20 = vadd.f32 %v1875_v14, %v1874_v41  ;;  %v1482_v23 = vpop.f32.mrb[44].mxu0 }
 0x368   :  { %v1840_v24 = vmul.f32 %v1703_v18, %v1616_v17  ;;  %v1483_v54 = vadd.f32 %v1482_v23, %v3274_v56  ;;  %v1484_v53 = vpop.f32.mrb[45].mxu0 }
 0x36a   :  { %v1877_v28 = vsel %vm1867_vm1, %v1840_v24, 0.0  ;;  %v1617_v16 = vmax.f32 %v1483_v54, 0.0  ;;  %v1733_v24 = vpop.permute.xlu0 %1732 }
 0x36b   :  { %v1878_v31 = vadd.f32 %v1877_v28, %v1876_v20  ;;  %v1487_v49 = vpop.f32.mrb[46].mxu0 }
 0x36c   :  { %v1841_v33 = vmul.f32 %v1708_v29, %v1617_v16  ;;  %v1488_v55 = vadd.f32 %v1487_v49, %v3276_v57  ;;  %v1489_v34 = vpop.f32.mrb[47].mxu0  ;;  %v1738_v49 = vpop.permute.xlu1 %1737 }
 0x36e   :  { %v1879_v4 = vsel %vm1867_vm1, %v1841_v33, 0.0  ;;  %v1618_v15 = vmax.f32 %v1488_v55, 0.0 }
 0x36f   :  { %v1880_v37 = vadd.f32 %v1879_v4, %v1878_v31  ;;  %v1492_v39 = vpop.f32.mrb[48].mxu0 }
 0x370   :  { %v1842_v1 = vmul.f32 %v1713_v35, %v1618_v15  ;;  %v1493_v56 = vadd.f32 %v1492_v39, %v3278_v58  ;;  %v1494_v40 = vpop.f32.mrb[49].mxu0 }
 0x372   :  { %v1881_v22 = vsel %vm1867_vm1, %v1842_v1, 0.0  ;;  %v1619_v42 = vmax.f32 %v1493_v56, 0.0 }
 0x373   :  { %v1882_v44 = vadd.f32 %v1881_v22, %v1880_v37  ;;  %v1497_v19 = vpop.f32.mrb[50].mxu0  ;;  %v1743_v37 = vpop.permute.xlu0 %1742 }
 0x374   :  { %v1843_v45 = vmul.f32 %v1718_v25, %v1619_v42  ;;  %v1498_v57 = vadd.f32 %v1497_v19, %v3280_v26  ;;  %v1499_v9 = vpop.f32.mrb[51].mxu0  ;;  %v1748_v25 = vpop.permute.xlu1 %1747 }
 0x376   :  { %v1883_v46 = vsel %vm1867_vm1, %v1843_v45, 0.0  ;;  %v1620_v47 = vmax.f32 %v1498_v57, 0.0 }
 0x377   :  { %v1884_v43 = vadd.f32 %v1883_v46, %v1882_v44  ;;  %v1502_v50 = vpop.f32.mrb[52].mxu0 }
 0x378   :  { %v1844_v51 = vmul.f32 %v1723_v48, %v1620_v47  ;;  %v1503_v58 = vadd.f32 %v1502_v50, %v3282_v59  ;;  %v1504_v41 = vpop.f32.mrb[53].mxu0  ;;  %v1753_v47 = vpop.permute.xlu0 %1752 }
 0x37a   :  { %v1885_v52 = vsel %vm1867_vm1, %v1844_v51, 0.0  ;;  %v1621_v27 = vmax.f32 %v1503_v58, 0.0 }
 0x37b   :  { %v1886_v21 = vadd.f32 %v1885_v52, %v1884_v43  ;;  %v1507_v14 = vpop.f32.mrb[54].mxu0  ;;  %v1758_v52 = vpop.permute.xlu1 %1757 }
 0x37c   :  { %v1845_v17 = vmul.f32 %v1728_v13, %v1621_v27  ;;  %v1508_v26 = vadd.f32 %v1507_v14, %v3284_v32  ;;  %v1509_v18 = vpop.f32.mrb[55].mxu0 }
 0x37d   :  { %v1763_v18 = vpop.permute.xlu0 %1762 }
 0x37e   :  { %v1887_v20 = vsel %vm1867_vm1, %v1845_v17, 0.0  ;;  %v1622_v23 = vmax.f32 %v1508_v26, 0.0 }
 0x37f   :  { %v1888_v54 = vadd.f32 %v1887_v20, %v1886_v21  ;;  %v1512_v53 = vpop.f32.mrb[56].mxu0 }
 0x380   :  { %v1846_v28 = vmul.f32 %v1733_v24, %v1622_v23  ;;  %v1513_v59 = vadd.f32 %v1512_v53, %v3286_v60  ;;  %v1514_v16 = vpop.f32.mrb[57].mxu0 }
 0x382   :  { %v1889_v29 = vsel %vm1867_vm1, %v1846_v28, 0.0  ;;  %v1623_v31 = vmax.f32 %v1513_v59, 0.0  ;;  %v1768_v59 = vpop.permute.xlu1 %1767 }
 0x383   :  { %v1890_v33 = vadd.f32 %v1889_v29, %v1888_v54  ;;  %v1517_v55 = vpop.f32.mrb[58].mxu0 }
 0x384   :  { %v1847_v34 = vmul.f32 %v1738_v49, %v1623_v31  ;;  %v1518_v32 = vadd.f32 %v1517_v55, %v3288_v61  ;;  %v1519_v4 = vpop.f32.mrb[59].mxu0 }
 0x386   :  { %v1891_v15 = vsel %vm1867_vm1, %v1847_v34, 0.0  ;;  %v1624_v35 = vmax.f32 %v1518_v32, 0.0  ;;  %v1773_v34 = vpop.permute.xlu0 %1772 }
 0x387   :  { %v1892_v39 = vadd.f32 %v1891_v15, %v1890_v33  ;;  %v1522_v1 = vpop.f32.mrb[60].mxu0 }
 0x388   :  { %v1848_v56 = vmul.f32 %v1743_v37, %v1624_v35  ;;  %v1523_v60 = vadd.f32 %v1522_v1, %v3290_v62  ;;  %v1524_v40 = vpop.f32.mrb[61].mxu0  ;;  %v1778_v1 = vpop.permute.xlu1 %1777 }
 0x38a   :  { %v1893_v22 = vsel %vm1867_vm1, %v1848_v56, 0.0  ;;  %v1625_v42 = vmax.f32 %v1523_v60, 0.0 }
 0x38b   :  { %v1894_v44 = vadd.f32 %v1893_v22, %v1892_v39  ;;  %v1527_v19 = vpop.f32.mrb[62].mxu0 }
 0x38c   :  { %v1849_v45 = vmul.f32 %v1748_v25, %v1625_v42  ;;  %v1528_v61 = vadd.f32 %v1527_v19, %v3292_v63  ;;  %v1529_v57 = vpop.f32.mrb[63].mxu0 }
 0x38e   :  { %v1895_v9 = vsel %vm1867_vm1, %v1849_v45, 0.0  ;;  %v1626_v46 = vmax.f32 %v1528_v61, 0.0 }
 0x38f   :  { %v1896_v48 = vadd.f32 %v1895_v9, %v1894_v44  ;;  %v1532_v43 = vpop.f32.mrb[64].mxu0  ;;  %v1783_v44 = vpop.permute.xlu0 %1782 }
 0x390   :  { %v1850_v50 = vmul.f32 %v1753_v47, %v1626_v46  ;;  %v1533_v62 = vadd.f32 %v1532_v43, %v3294_v30  ;;  %v1534_v51 = vpop.f32.mrb[65].mxu0  ;;  %v1788_v9 = vpop.permute.xlu1 %1787 }
 0x392   :  { %v1897_v58 = vsel %vm1867_vm1, %v1850_v50, 0.0  ;;  %v1627_v41 = vmax.f32 %v1533_v62, 0.0 }
 0x393   :  { %v1898_v27 = vadd.f32 %v1897_v58, %v1896_v48  ;;  %v1537_v13 = vpop.f32.mrb[66].mxu0  ;;  %v1793_v51 = vpop.permute.xlu0 %1792 }
 0x394   :  { %v1851_v21 = vmul.f32 %v1758_v52, %v1627_v41  ;;  %v1538_v63 = vadd.f32 %v1537_v13, %v3296_v0  ;;  %v1539_v14 = vpop.f32.mrb[67].mxu0  ;;  %v1798_v52 = vpop.permute.xlu1 %1797 }
 0x396   :  { %v1899_v17 = vsel %vm1867_vm1, %v1851_v21, 0.0  ;;  %v1628_v26 = vmax.f32 %v1538_v63, 0.0 }
 0x397   :  { %v1900_v20 = vadd.f32 %v1899_v17, %v1898_v27  ;;  %v1542_v23 = vpop.f32.mrb[68].mxu0 }
 0x398   :  { %v1852_v24 = vmul.f32 %v1763_v18, %v1628_v26  ;;  %v1543_v30 = vadd.f32 %v1542_v23, %v3298_v2  ;;  %v1544_v54 = vpop.f32.mrb[69].mxu0  ;;  %v1803_v26 = vpop.permute.xlu0 %1802 }
 0x39a   :  { %v1901_v53 = vsel %vm1867_vm1, %v1852_v24, 0.0  ;;  %v1629_v28 = vmax.f32 %v1543_v30, 0.0  ;;  %v1808_v30 = vpop.permute.xlu1 %1807 }
 0x39b   :  { %v1902_v16 = vadd.f32 %v1901_v53, %v1900_v20  ;;  %v1547_v29 = vpop.f32.mrb[70].mxu0 }
 0x39c   :  { %v1853_v31 = vmul.f32 %v1768_v59, %v1629_v28  ;;  %v1548_v0 = vadd.f32 %v1547_v29, %v3300_v3  ;;  %v1549_v49 = vpop.f32.mrb[71].mxu0 }
 0x39e   :  { %v1903_v33 = vsel %vm1867_vm1, %v1853_v31, 0.0  ;;  %v1630_v55 = vmax.f32 %v1548_v0, 0.0  ;;  %v1374_v31 = vpop.permute.xlu0 %1373 }
 0x39f   :  { %v1904_v32 = vadd.f32 %v1903_v33, %v1902_v16  ;;  %v1552_v4 = vpop.f32.mrb[72].mxu0  ;;  %v1813_v33 = vpop.permute.xlu1 %1812 }
 0x3a0   :  { %v1854_v15 = vmul.f32 %v1773_v34, %v1630_v55  ;;  %v1553_v2 = vadd.f32 %v1552_v4, %v3302_v6  ;;  %v1554_v35 = vpop.f32.mrb[73].mxu0 }
 0x3a2   :  { %v1905_v37 = vsel %vm1867_vm1, %v1854_v15, 0.0  ;;  %v1631_v39 = vmax.f32 %v1553_v2, 0.0  ;;  %v1379_v35 = vpop.permute.xlu0 %1378 }
 0x3a3   :  { %v1906_v56 = vadd.f32 %v1905_v37, %v1904_v32  ;;  %v1557_v60 = vpop.f32.mrb[74].mxu0 }
 0x3a4   :  { %v1855_v40 = vmul.f32 %v1778_v1, %v1631_v39  ;;  %v1558_v3 = vadd.f32 %v1557_v60, %v3304_v5  ;;  %v1559_v22 = vpop.f32.mrb[75].mxu0  ;;  %v1818_v60 = vpop.permute.xlu1 %1817 }
 0x3a6   :  { %v1907_v42 = vsel %vm1867_vm1, %v1855_v40, 0.0  ;;  %v1632_v25 = vmax.f32 %v1558_v3, 0.0 }
 0x3a7   :  { %v1908_v19 = vadd.f32 %v1907_v42, %v1906_v56  ;;  %v1562_v45 = vpop.f32.mrb[76].mxu0 }
 0x3a8   :  { %v1856_v61 = vmul.f32 %v1783_v44, %v1632_v25  ;;  %v1563_v6 = vadd.f32 %v1562_v45, %v3306_v7  ;;  %v1564_v57 = vpop.f32.mrb[77].mxu0 }
 0x3aa   :  { %v1909_v46 = vsel %vm1867_vm1, %v1856_v61, 0.0  ;;  %v1633_v47 = vmax.f32 %v1563_v6, 0.0  ;;  %v1823_v6 = vpop.permute.xlu1 %1822 }
 0x3ab   :  { %v1910_v48 = vadd.f32 %v1909_v46, %v1908_v19  ;;  %v1567_v43 = vpop.f32.mrb[78].mxu0  ;;  %v1384_v19 = vpop.permute.xlu0 %1383 }
 0x3ac   :  { %v1857_v50 = vmul.f32 %v1788_v9, %v1633_v47  ;;  %v1568_v5 = vadd.f32 %v1567_v43, %v3308_v38  ;;  %v1569_v62 = vpop.f32.mrb[79].mxu0 }
 0x3ae   :  { %v1911_v58 = vsel %vm1867_vm1, %v1857_v50, 0.0  ;;  %v1634_v41 = vmax.f32 %v1568_v5, 0.0 }
 0x3af   :  { %v1912_v27 = vadd.f32 %v1911_v58, %v1910_v48  ;;  %v1572_v13 = vpop.f32.mrb[80].mxu0  ;;  %v1828_v50 = vpop.permute.xlu0 %1827 }
 0x3b0   :  { %v1858_v21 = vmul.f32 %v1793_v51, %v1634_v41  ;;  %v1573_v7 = vadd.f32 %v1572_v13, %v3310_v8  ;;  %v1574_v63 = vpop.f32.mrb[81].mxu0  ;;  %v1833_v13 = vpop.permute.xlu1 %1832 }
 0x3b2   :  { %v1913_v14 = vsel %vm1867_vm1, %v1858_v21, 0.0  ;;  %v1635_v17 = vmax.f32 %v1573_v7, 0.0 }
 0x3b3   :  { %v1914_v18 = vadd.f32 %v1913_v14, %v1912_v27  ;;  %v1577_v20 = vpop.f32.mrb[82].mxu0  ;;  %v1943_v14 = vlaneseq }
 0x3b4   :  { %v1859_v23 = vmul.f32 %v1798_v52, %v1635_v17  ;;  %v1578_v38 = vadd.f32 %v1577_v20, %v3312_v10  ;;  %v1579_v24 = vpop.f32.mrb[83].mxu0 }
 0x3b6   :  { %v1915_v54 = vsel %vm1867_vm1, %v1859_v23, 0.0  ;;  %v1636_v53 = vmax.f32 %v1578_v38, 0.0 }
 0x3b7   :  { %v1916_v28 = vadd.f32 %v1915_v54, %v1914_v18  ;;  %v1582_v59 = vpop.f32.mrb[84].mxu0  ;;  %v1944_v18 = vshrl.u32 %v1943_v14, 7 }
 0x3b8   :  { %v1860_v16 = vmul.f32 %v1803_v26, %v1636_v53  ;;  %v1583_v8 = vadd.f32 %v1582_v59, %v3314_v12  ;;  %v1584_v29 = vpop.f32.mrb[85].mxu0 }
 0x3b9   :  { %v1945_v38 = vsub.s32 0, %v1944_v18 }
 0x3ba   :  { %v1917_v0 = vsel %vm1867_vm1, %v1860_v16, 0.0  ;;  %v1637_v49 = vmax.f32 %v1583_v8, 0.0 }
 0x3bb   :  { %v1918_v55 = vadd.f32 %v1917_v0, %v1916_v28  ;;  %v1587_v34 = vpop.f32.mrb[86].mxu0 }
 0x3bc   :  { %v1861_v32 = vmul.f32 %v1808_v30, %v1637_v49  ;;  %v1588_v10 = vadd.f32 %v1587_v34, %v3316_v36  ;;  %v1589_v4 = vpop.f32.mrb[87].mxu0  ;;  %v1941_v30 = vpop.permute.xlu0 %1940 }
 0x3bd   :  { %v1946_v53 = vrot.slane %v1941_v30, %v1945_v38 }
 0x3be   :  { %v1919_v15 = vsel %vm1867_vm1, %v1861_v32, 0.0  ;;  %v1638_v2 = vmax.f32 %v1588_v10, 0.0 }
 0x3bf   :  { %v1920_v37 = vadd.f32 %v1919_v15, %v1918_v55  ;;  %v1592_v39 = vpop.f32.mrb[88].mxu0 }
 0x3c0   :  { %v1862_v1 = vmul.f32 %v1813_v33, %v1638_v2  ;;  %v1593_v12 = vadd.f32 %v1592_v39, %v3318_v11  ;;  %v1594_v56 = vpop.f32.mrb[89].mxu0 }
 0x3c2   :  { %v1921_v40 = vsel %vm1867_vm1, %v1862_v1, 0.0  ;;  %v1639_v3 = vmax.f32 %v1593_v12, 0.0 }
 0x3c3   :  { %v1922_v22 = vadd.f32 %v1921_v40, %v1920_v37  ;;  %v1597_v42 = vpop.f32.mrb[90].mxu0 }
 0x3c4   :  { %v1863_v25 = vmul.f32 %v1818_v60, %v1639_v3  ;;  %v1598_v44 = vadd.f32 %v1597_v42, %v1374_v31  ;;  %v1599_v36 = vpop.f32.mrb[91].mxu0 }
 0x3c6   :  { %v1923_v45 = vsel %vm1867_vm1, %v1863_v25, 0.0  ;;  %v1640_v61 = vmax.f32 %v1598_v44, 0.0 }
 0x3c7   :  { %v1924_v57 = vadd.f32 %v1923_v45, %v1922_v22  ;;  %v1602_v9 = vpop.f32.mrb[92].mxu0 }
 0x3c8   :  { %v1864_v46 = vmul.f32 %v1823_v6, %v1640_v61  ;;  %v1603_v47 = vadd.f32 %v1602_v9, %v1379_v35  ;;  %v1604_v11 = vpop.f32.mrb[93].mxu0 }
 0x3ca   :  { %v1925_v48 = vsel %vm1867_vm1, %v1864_v46, 0.0  ;;  %v1641_v43 = vmax.f32 %v1603_v47, 0.0 }
 0x3cb   :  { %v1926_v5 = vadd.f32 %v1925_v48, %v1924_v57  ;;  %v1607_v62 = vpop.f32.mrb[94].mxu0 }
 0x3cc   :  { %v1865_v51 = vmul.f32 %v1828_v50, %v1641_v43  ;;  %v1608_v58 = vadd.f32 %v1607_v62, %v1384_v19  ;;  %v1609_v41 = vpop.f32.mrb[95].mxu0 }
 0x3ce   :  { %v1927_v52 = vsel %vm1867_vm1, %v1865_v51, 0.0  ;;  %v1642_v27 = vmax.f32 %v1608_v58, 0.0 }
 0x3cf   :  { %v1928_v21 = vadd.f32 %v1927_v52, %v1926_v5 }
 0x3d0   :  { %v1866_v7 = vmul.f32 %v1833_v13, %v1642_v27 }
 0x3d2   :  { %v1929_v63 = vsel %vm1867_vm1, %v1866_v7, 0.0 }
 0x3d3   :  { %v1930_v17 = vadd.f32 %v1929_v63, %v1928_v21 }
 0x3d5   :  { %v1931_v26 = vrot.slane %v1930_v17, 4 }
 0x3d7   :  { %v1932_v20 = vadd.f32 %v1931_v26, %v1930_v17 }
 0x3d9   :  { %v1933_v23 = vrot.slane %v1932_v20, 2 }
 0x3db   :  { %v1934_v24 = vadd.f32 %v1933_v23, %v1932_v20 }
 0x3dd   :  { %v1935_v54 = vrot.slane %v1934_v24, 1 }
 0x3df   :  { %v1936_v28 = vadd.f32 %v1935_v54, %v1934_v24 }
 0x3e1   :  { %v1947_v59 = vadd.f32 %v1946_v53, %v1936_v28 }
 0x3e3   :  { %1949 = vst.msk [vmem:[#allocation3] sm:$0x1] %vm1948_vm2, %v1947_v59 }
 0x3e4   :  { %2192 = shalt.err (!%p2189_p4)
}
 0x3e5   :  { %s2193_s15 = scalar_lea.hbm %s3397_s9, 16 }
 0x3e6   :  { %p2194_p5 = scmp.ne.s32.totalorder %s3397_s9, %s2193_s15  ;;  %p2197_p6 = scmp.lt.u32.totalorder %s2193_s15, %s3397_s9 }
 0x3e8   :  { %p2199_p7 = pnand %p2197_p6, %p2194_p5 }
 0x3ea   :  { %2202 = shalt.err (!%p2199_p7)
}
 0x3eb   :  { %1959 = dma.vmem_to_hbm [thread:$0]  %s1957_s12, 16, %s3397_s9, [#allocation4]  }
 0x3ec   :  { %2203 = dma.done.wait [#allocation4], 16  }
 0x3ed   :  { %2204 = vsyncadd [#allocation4], 4294967280 }
 0x3ee   :  { %1963 = vsyncpa [#allocation4], 1 }

</bundles_post_ra>
